<compile_context>
chip_gen: v5e
topology: v5e:2x2
jax: 0.10.0
libtpu: 0.0.40
codegen_flags: <defaults>
</compile_context>

<pallas_src>
import functools

import jax
import jax.numpy as jnp
from jax import lax
from jax.experimental import pallas as pl
from jax.experimental.pallas import tpu as pltpu

NEG_INF = -1e30  # large-negative additive mask (avoids -inf/NaN corner cases)


def _layernorm(y, w, b, eps=1e-5):
    mu = jnp.mean(y, axis=-1, keepdims=True)
    var = jnp.mean((y - mu) ** 2, axis=-1, keepdims=True)
    return (y - mu) * lax.rsqrt(var + eps) * w + b


def transformer_block_kernel(
    # inputs
    xq_ref, xkv_ref, wq_ref, wkv_ref, wu_ref,
    ln1w_ref, ln1b_ref, w1_ref, b1_ref, w2_ref, b2_ref, ln2w_ref, ln2b_ref,
    # outputs
    o_ref,
    # scratch
    q_scr, acc_scr, m_scr, l_scr,
    *, num_heads, k_dim, tq, tk,
):
    qi = pl.program_id(1)
    kvi = pl.program_id(2)
    H, kd = num_heads, k_dim
    HK = H * kd
    K = xq_ref.shape[-1]

    # ---- once per (batch, q-tile): project Q (bf16, pre-scaled) and reset online-softmax state.
    @pl.when(kvi == 0)
    def _init():
        xq = xq_ref[...].astype(jnp.bfloat16)                               # (TQ, K)
        q = jnp.dot(xq, wq_ref[...].astype(jnp.bfloat16),
                    preferred_element_type=jnp.float32)                     # (TQ, H*kd) fp32
        # fold the full 1/sqrt(kd) score scale into Q (== q/kd^.25 and k/kd^.25 in the reference)
        q_scr[...] = (q * (kd ** -0.5)).astype(jnp.bfloat16)
        m_scr[...] = jnp.full_like(m_scr, NEG_INF)
        l_scr[...] = jnp.zeros_like(l_scr)
        acc_scr[...] = jnp.zeros_like(acc_scr)

    # ---- one kv tile of causal attention (tiles fully above the diagonal are skipped).
    @pl.when(kvi <= qi)
    def _attend():
        xkv = xkv_ref[...].astype(jnp.bfloat16)                             # (TK, K)
        kv = jnp.dot(xkv, wkv_ref[...].astype(jnp.bfloat16),
                     preferred_element_type=jnp.float32)                    # (TK, 2*H*kd)
        k_t = kv[:, :HK].astype(jnp.bfloat16)
        v_t = kv[:, HK:].astype(jnp.bfloat16)

        # tile-local causal mask (additive large-negative)
        row = qi * tq + lax.broadcasted_iota(jnp.int32, (tq, tk), 0)
        col = kvi * tk + lax.broadcasted_iota(jnp.int32, (tq, tk), 1)
        neg = jnp.where(col <= row, 0.0, NEG_INF).astype(jnp.float32)

        for hi in range(H):                                                 # statically unrolled
            qh = q_scr[:, hi * kd:(hi + 1) * kd]                            # (TQ, kd) bf16
            kh = k_t[:, hi * kd:(hi + 1) * kd]                              # (TK, kd) bf16
            vh = v_t[:, hi * kd:(hi + 1) * kd]                              # (TK, kd) bf16
            # q @ k^T without an explicit transpose: contract last dims of both operands
            s = lax.dot_general(qh, kh, (((1,), (1,)), ((), ())),
                                preferred_element_type=jnp.float32) + neg   # (TQ, TK) fp32
            m_prev = m_scr[hi]                                              # (TQ, 1)
            m_new = jnp.maximum(m_prev, jnp.max(s, axis=-1, keepdims=True))
            alpha = jnp.exp(m_prev - m_new)
            p = jnp.exp(s - m_new)                                          # fp32
            l_scr[hi] = alpha * l_scr[hi] + jnp.sum(p, axis=-1, keepdims=True)
            acc_scr[hi] = alpha * acc_scr[hi] + jnp.dot(
                p.astype(jnp.bfloat16), vh, preferred_element_type=jnp.float32)
            m_scr[hi] = m_new

    # ---- last needed kv tile for this q tile: finalize attention, LN -> FFN -> LN, write out.
    @pl.when(kvi == qi)
    def _finalize():
        xq = xq_ref[...]                                                    # (TQ, K) fp32 residual
        attended = jnp.zeros((tq, K), jnp.float32)
        for hi in range(H):
            inv_l = pl.reciprocal(l_scr[hi], approx=True)                   # (TQ, 1) on EUP
            oh = (acc_scr[hi] * inv_l).astype(jnp.bfloat16)                 # (TQ, kd)
            attended = attended + jnp.dot(
                oh, wu_ref[hi * kd:(hi + 1) * kd, :].astype(jnp.bfloat16),
                preferred_element_type=jnp.float32)
        y = _layernorm(attended + xq, ln1w_ref[...], ln1b_ref[...])
        h1 = jnp.dot(y.astype(jnp.bfloat16), w1_ref[...].astype(jnp.bfloat16),
                     preferred_element_type=jnp.float32) + b1_ref[...]
        h1 = jnp.maximum(h1, 0.0)
        ff = jnp.dot(h1.astype(jnp.bfloat16), w2_ref[...].astype(jnp.bfloat16),
                     preferred_element_type=jnp.float32) + b2_ref[...]
        z = _layernorm(ff + y, ln2w_ref[...], ln2b_ref[...])
        o_ref[...] = z.astype(o_ref.dtype)


def transformer_block(x, params, *, num_heads, k_dim, block_q=128, block_kv=128):
    B, S, K = x.shape
    assert K == k_dim
    tq = tk = min(block_q, block_kv, S)          # keep TQ == TK so the diagonal tile index is qi
    assert S % tq == 0, "sequence length must be divisible by the tile size"
    nq, nkv = S // tq, S // tk
    HK = num_heads * k_dim

    # fuse K and V projection weights -> a single matmul per kv tile
    wkv = jnp.concatenate([params["wk"], params["wv"]], axis=1)             # (K, 2*H*kd)

    grid = (B, nq, nkv)
    full2d = lambda a: pl.BlockSpec(a.shape, lambda b, i, j: (0, 0))
    in_specs = [
        # q-side rows of x (also the residual); block index constant across the kv axis -> 1 DMA
        pl.BlockSpec((None, tq, K), lambda b, i, j: (b, i, 0)),
        # kv-side rows of x; min() collapses DMAs for tiles above the causal diagonal
        pl.BlockSpec((None, tk, K), lambda b, i, j: (b, jnp.minimum(j, i), 0)),
        full2d(params["wq"]), full2d(wkv), full2d(params["wu"]),
        full2d(params["ln1w"]), full2d(params["ln1b"]),
        full2d(params["w1"]), full2d(params["b1"]),
        full2d(params["w2"]), full2d(params["b2"]),
        full2d(params["ln2w"]), full2d(params["ln2b"]),
    ]
    out_specs = pl.BlockSpec((None, tq, K), lambda b, i, j: (b, i, 0))

    kernel = functools.partial(
        transformer_block_kernel, num_heads=num_heads, k_dim=k_dim, tq=tq, tk=tk)

    # advisory cost estimate so XLA can schedule surrounding ops around the custom call
    n_pairs = nq * (nq + 1) // 2
    flops = int(
        2 * B * S * K * HK                          # Q projection
        + 2 * B * (tk * n_pairs) * K * 2 * HK       # fused K/V projection
        + 4 * B * num_heads * tq * tk * n_pairs * k_dim   # QK^T + PV
        + 2 * B * S * HK * K                        # head unify
        + 16 * B * S * K * K                        # FFN
    )
    transcendentals = int(B * num_heads * tq * tk * n_pairs + 4 * B * S)
    weight_bytes = sum(int(v.size) * 4 for v in params.values()) + int(wkv.size) * 4
    bytes_accessed = int(3 * B * S * K * 4 + weight_bytes)

    return pl.pallas_call(
        kernel,
        out_shape=jax.ShapeDtypeStruct((B, S, K), x.dtype),
        grid_spec=pltpu.PrefetchScalarGridSpec(
            num_scalar_prefetch=0,
            grid=grid,
            in_specs=in_specs,
            out_specs=out_specs,
            scratch_shapes=[
                pltpu.VMEM((tq, HK), jnp.bfloat16),               # cached, pre-scaled Q
                pltpu.VMEM((num_heads, tq, k_dim), jnp.float32),  # online-softmax accumulator
                pltpu.VMEM((num_heads, tq, 1), jnp.float32),      # running max
                pltpu.VMEM((num_heads, tq, 1), jnp.float32),      # running sum
            ],
        ),
        compiler_params=pltpu.CompilerParams(
            dimension_semantics=("parallel", "parallel", "arbitrary"),
            vmem_limit_bytes=64 * 1024 * 1024,
        ),
        cost_estimate=pl.CostEstimate(
            flops=flops, transcendentals=transcendentals, bytes_accessed=bytes_accessed),
    )(x, x, params["wq"], wkv, params["wu"],
      params["ln1w"], params["ln1b"],
      params["w1"], params["b1"], params["w2"], params["b2"],
      params["ln2w"], params["ln2b"])


def reference_block(x, p, *, num_heads, k_dim):
    """Pure-JAX fp32 reference mirroring the PyTorch forward."""
    B, S, K = x.shape
    h, kd = num_heads, k_dim
    q = (x @ p["wq"]).reshape(B, S, h, kd).transpose(0, 2, 1, 3) / kd ** 0.25
    kk = (x @ p["wk"]).reshape(B, S, h, kd).transpose(0, 2, 1, 3) / kd ** 0.25
    v = (x @ p["wv"]).reshape(B, S, h, kd).transpose(0, 2, 1, 3)
    dot = jnp.einsum("bhsk,bhtk->bhst", q, kk)
    mask = jnp.tril(jnp.ones((S, S), bool))
    dot = jnp.where(mask, dot, -jnp.inf)
    w = jax.nn.softmax(dot, axis=-1)
    ho = jnp.einsum("bhst,bhtk->bhsk", w, v).transpose(0, 2, 1, 3).reshape(B, S, h * kd)
    attended = ho @ p["wu"]
    y = _layernorm(attended + x, p["ln1w"], p["ln1b"])
    ff = jnp.maximum(y @ p["w1"] + p["b1"], 0.0) @ p["w2"] + p["b2"]
    return _layernorm(ff + y, p["ln2w"], p["ln2b"])


def init_params(key, k_dim, num_heads):
    ks = jax.random.split(key, 8)
    hk = num_heads * k_dim
    s = lambda fan_in: 1.0 / jnp.sqrt(fan_in)
    return {
        "wq": jax.random.uniform(ks[0], (k_dim, hk), jnp.float32, -s(k_dim), s(k_dim)),
        "wk": jax.random.uniform(ks[1], (k_dim, hk), jnp.float32, -s(k_dim), s(k_dim)),
        "wv": jax.random.uniform(ks[2], (k_dim, hk), jnp.float32, -s(k_dim), s(k_dim)),
        "wu": jax.random.uniform(ks[3], (hk, k_dim), jnp.float32, -s(hk), s(hk)),
        "ln1w": jnp.ones((1, k_dim), jnp.float32),
        "ln1b": jnp.zeros((1, k_dim), jnp.float32),
        "w1": jax.random.uniform(ks[4], (k_dim, 4 * k_dim), jnp.float32, -s(k_dim), s(k_dim)),
        "b1": jax.random.uniform(ks[5], (1, 4 * k_dim), jnp.float32, -s(k_dim), s(k_dim)),
        "w2": jax.random.uniform(ks[6], (4 * k_dim, k_dim), jnp.float32, -s(4 * k_dim), s(4 * k_dim)),
        "b2": jax.random.uniform(ks[7], (1, k_dim), jnp.float32, -s(4 * k_dim), s(4 * k_dim)),
        "ln2w": jnp.ones((1, k_dim), jnp.float32),
        "ln2b": jnp.zeros((1, k_dim), jnp.float32),
    }


if __name__ == "__main__":
    batch, seq, k_dim, num_heads = 2, 8, 32, 4
    key = jax.random.PRNGKey(0)
    kx, kp = jax.random.split(key)
    x = jax.random.normal(kx, (batch, seq, k_dim), jnp.float32)
    params = init_params(kp, k_dim, num_heads)

    out = transformer_block(x, params, num_heads=num_heads, k_dim=k_dim)
    out = jax.block_until_ready(out)

    ref = reference_block(x, params, num_heads=num_heads, k_dim=k_dim)
    assert out.shape == (batch, seq, k_dim)
    # bf16 MXU inputs (fp32 accumulation) -> looser tolerance vs the pure fp32 reference
    assert jnp.allclose(out, ref, atol=5e-2, rtol=5e-2), "mismatch vs pure-JAX reference"
    print("KERNEL_OK")
</pallas_src>

<mosaic_0001>
module attributes {stable_mosaic.version = 11 : i64} {
  func.func @transformer_block_kernel(%arg0: i32, %arg1: i32, %arg2: i32, %arg3: memref<1x8x32xf32, #tpu.memory_space<vmem>>, %arg4: memref<1x8x32xf32, #tpu.memory_space<vmem>>, %arg5: memref<32x128xf32, #tpu.memory_space<vmem>>, %arg6: memref<32x256xf32, #tpu.memory_space<vmem>>, %arg7: memref<128x32xf32, #tpu.memory_space<vmem>>, %arg8: memref<1x32xf32, #tpu.memory_space<vmem>>, %arg9: memref<1x32xf32, #tpu.memory_space<vmem>>, %arg10: memref<32x128xf32, #tpu.memory_space<vmem>>, %arg11: memref<1x128xf32, #tpu.memory_space<vmem>>, %arg12: memref<128x32xf32, #tpu.memory_space<vmem>>, %arg13: memref<1x32xf32, #tpu.memory_space<vmem>>, %arg14: memref<1x32xf32, #tpu.memory_space<vmem>>, %arg15: memref<1x32xf32, #tpu.memory_space<vmem>>, %arg16: memref<1x8x32xf32, #tpu.memory_space<vmem>>, %arg17: memref<8x128xbf16, #tpu.memory_space<vmem>>, %arg18: memref<4x8x32xf32, #tpu.memory_space<vmem>>, %arg19: memref<4x8x1xf32, #tpu.memory_space<vmem>>, %arg20: memref<4x8x1xf32, #tpu.memory_space<vmem>>) attributes {dimension_semantics = [#tpu.dimension_semantics<parallel>, #tpu.dimension_semantics<parallel>, #tpu.dimension_semantics<arbitrary>], iteration_bounds = array<i64: 2, 1, 1>, scalar_prefetch = 0 : i64, scratch_operands = 4 : i64, tpu.core_type = #tpu.core_type<tc>, window_params = [{transform_indices = @transform_0, window_bounds = array<i64: 1, 8, 32>}, {transform_indices = @transform_1, window_bounds = array<i64: 1, 8, 32>}, {pipeline_mode = #tpu.pipeline_mode<synchronous>, transform_indices = @transform_2, window_bounds = array<i64: 32, 128>}, {pipeline_mode = #tpu.pipeline_mode<synchronous>, transform_indices = @transform_3, window_bounds = array<i64: 32, 256>}, {pipeline_mode = #tpu.pipeline_mode<synchronous>, transform_indices = @transform_4, window_bounds = array<i64: 128, 32>}, {pipeline_mode = #tpu.pipeline_mode<synchronous>, transform_indices = @transform_5, window_bounds = array<i64: 1, 32>}, {pipeline_mode = #tpu.pipeline_mode<synchronous>, transform_indices = @transform_6, window_bounds = array<i64: 1, 32>}, {pipeline_mode = #tpu.pipeline_mode<synchronous>, transform_indices = @transform_7, window_bounds = array<i64: 32, 128>}, {pipeline_mode = #tpu.pipeline_mode<synchronous>, transform_indices = @transform_8, window_bounds = array<i64: 1, 128>}, {pipeline_mode = #tpu.pipeline_mode<synchronous>, transform_indices = @transform_9, window_bounds = array<i64: 128, 32>}, {pipeline_mode = #tpu.pipeline_mode<synchronous>, transform_indices = @transform_10, window_bounds = array<i64: 1, 32>}, {pipeline_mode = #tpu.pipeline_mode<synchronous>, transform_indices = @transform_11, window_bounds = array<i64: 1, 32>}, {pipeline_mode = #tpu.pipeline_mode<synchronous>, transform_indices = @transform_12, window_bounds = array<i64: 1, 32>}, {transform_indices = @transform_13, window_bounds = array<i64: 1, 8, 32>}]} {
    %c0_i32 = arith.constant 0 : i32
    %0 = arith.cmpi eq, %arg2, %c0_i32 : i32
    %1 = arith.extui %0 : i1 to i32
    %c0_i32_0 = arith.constant 0 : i32
    %2 = arith.cmpi ne, %1, %c0_i32_0 : i32
    scf.if %2 {
      %c0 = arith.constant 0 : index
      %c0_3 = arith.constant 0 : index
      %c0_4 = arith.constant 0 : index
      %9 = vector.load %arg3[%c0, %c0_3, %c0_4] : memref<1x8x32xf32, #tpu.memory_space<vmem>>, vector<1x8x32xf32>
      %10 = vector.shape_cast %9 : vector<1x8x32xf32> to vector<8x32xf32>
      %11 = arith.truncf %10 : vector<8x32xf32> to vector<8x32xbf16>
      %c0_5 = arith.constant 0 : index
      %c0_6 = arith.constant 0 : index
      %12 = vector.load %arg5[%c0_5, %c0_6] : memref<32x128xf32, #tpu.memory_space<vmem>>, vector<32x128xf32>
      %13 = arith.truncf %12 : vector<32x128xf32> to vector<32x128xbf16>
      %cst = arith.constant dense<0.000000e+00> : vector<8x128xf32>
      %14 = tpu.matmul %11, %13, %cst {dimension_numbers = #tpu.dot_dimension_numbers<[1], [0], [0], [1], [0, 0, 1, 1], [], []>} : vector<8x32xbf16>, vector<32x128xbf16>, vector<8x128xf32> -> vector<8x128xf32>
      %cst_7 = arith.constant 0.176776692 : f32
      %15 = vector.broadcast %cst_7 : f32 to vector<8x128xf32>
      %16 = arith.mulf %14, %15 : vector<8x128xf32>
      %17 = arith.truncf %16 : vector<8x128xf32> to vector<8x128xbf16>
      %c0_8 = arith.constant 0 : index
      %c0_9 = arith.constant 0 : index
      %18 = vector.load %arg17[%c0_8, %c0_9] : memref<8x128xbf16, #tpu.memory_space<vmem>>, vector<8x128xbf16>
      tpu.vector_store %arg17[%c0_8, %c0_9], %17 {strides = array<i32>} : memref<8x128xbf16, #tpu.memory_space<vmem>>, vector<8x128xbf16>,
      %cst_10 = arith.constant -1.000000e+30 : f32
      %19 = vector.broadcast %cst_10 : f32 to vector<4x8x1xf32>
      %c0_11 = arith.constant 0 : index
      %c0_12 = arith.constant 0 : index
      %c0_13 = arith.constant 0 : index
      %20 = vector.load %arg19[%c0_11, %c0_12, %c0_13] : memref<4x8x1xf32, #tpu.memory_space<vmem>>, vector<4x8x1xf32>
      tpu.vector_store %arg19[%c0_11, %c0_12, %c0_13], %19 {strides = array<i32>} : memref<4x8x1xf32, #tpu.memory_space<vmem>>, vector<4x8x1xf32>,
      %cst_14 = arith.constant 0.000000e+00 : f32
      %21 = vector.broadcast %cst_14 : f32 to vector<4x8x1xf32>
      %c0_15 = arith.constant 0 : index
      %c0_16 = arith.constant 0 : index
      %c0_17 = arith.constant 0 : index
      %22 = vector.load %arg20[%c0_15, %c0_16, %c0_17] : memref<4x8x1xf32, #tpu.memory_space<vmem>>, vector<4x8x1xf32>
      tpu.vector_store %arg20[%c0_15, %c0_16, %c0_17], %21 {strides = array<i32>} : memref<4x8x1xf32, #tpu.memory_space<vmem>>, vector<4x8x1xf32>,
      %cst_18 = arith.constant 0.000000e+00 : f32
      %23 = vector.broadcast %cst_18 : f32 to vector<4x8x32xf32>
      %c0_19 = arith.constant 0 : index
      %c0_20 = arith.constant 0 : index
      %c0_21 = arith.constant 0 : index
      %24 = vector.load %arg18[%c0_19, %c0_20, %c0_21] : memref<4x8x32xf32, #tpu.memory_space<vmem>>, vector<4x8x32xf32>
      tpu.vector_store %arg18[%c0_19, %c0_20, %c0_21], %23 {strides = array<i32>} : memref<4x8x32xf32, #tpu.memory_space<vmem>>, vector<4x8x32xf32>,
    } else {
    }
    %3 = arith.cmpi sle, %arg2, %arg1 : i32
    %4 = arith.extui %3 : i1 to i32
    %c0_i32_1 = arith.constant 0 : i32
    %5 = arith.cmpi ne, %4, %c0_i32_1 : i32
    scf.if %5 {
      %c0 = arith.constant 0 : index
      %c0_3 = arith.constant 0 : index
      %c0_4 = arith.constant 0 : index
      %9 = vector.load %arg4[%c0, %c0_3, %c0_4] : memref<1x8x32xf32, #tpu.memory_space<vmem>>, vector<1x8x32xf32>
      %10 = vector.shape_cast %9 : vector<1x8x32xf32> to vector<8x32xf32>
      %11 = arith.truncf %10 : vector<8x32xf32> to vector<8x32xbf16>
      %c0_5 = arith.constant 0 : index
      %c0_6 = arith.constant 0 : index
      %12 = vector.load %arg6[%c0_5, %c0_6] : memref<32x256xf32, #tpu.memory_space<vmem>>, vector<32x256xf32>
      %13 = arith.truncf %12 : vector<32x256xf32> to vector<32x256xbf16>
      %cst = arith.constant dense<0.000000e+00> : vector<8x256xf32>
      %14 = tpu.matmul %11, %13, %cst {dimension_numbers = #tpu.dot_dimension_numbers<[1], [0], [0], [1], [0, 0, 1, 1], [], []>} : vector<8x32xbf16>, vector<32x256xbf16>, vector<8x256xf32> -> vector<8x256xf32>
      %15 = vector.extract_strided_slice %14 {offsets = [0, 0], sizes = [8, 128], strides = [1, 1]} : vector<8x256xf32> to vector<8x128xf32>
      %16 = arith.truncf %15 : vector<8x128xf32> to vector<8x128xbf16>
      %17 = vector.extract_strided_slice %14 {offsets = [0, 128], sizes = [8, 128], strides = [1, 1]} : vector<8x256xf32> to vector<8x128xf32>
      %18 = arith.truncf %17 : vector<8x128xf32> to vector<8x128xbf16>
      %c8_i32 = arith.constant 8 : i32
      %19 = arith.muli %arg1, %c8_i32 : i32
      %20 = tpu.iota {dimensions = array<i32: 0>} : vector<8x8xi32>
      %21 = vector.broadcast %19 : i32 to vector<8x8xi32>
      %22 = arith.addi %21, %20 : vector<8x8xi32>
      %c8_i32_7 = arith.constant 8 : i32
      %23 = arith.muli %arg2, %c8_i32_7 : i32
      %24 = tpu.iota {dimensions = array<i32: 1>} : vector<8x8xi32>
      %25 = vector.broadcast %23 : i32 to vector<8x8xi32>
      %26 = arith.addi %25, %24 : vector<8x8xi32>
      %27 = arith.cmpi sle, %26, %22 : vector<8x8xi32>
      %cst_8 = arith.constant 0.000000e+00 : f32
      %cst_9 = arith.constant -1.000000e+30 : f32
      %28 = vector.broadcast %cst_8 : f32 to vector<8x8xf32>
      %29 = vector.broadcast %cst_9 : f32 to vector<8x8xf32>
      %30 = arith.select %27, %28, %29 : vector<8x8xi1>, vector<8x8xf32>
      %c0_10 = arith.constant 0 : index
      %c0_11 = arith.constant 0 : index
      %31 = vector.load %arg17[%c0_10, %c0_11] : memref<8x128xbf16, #tpu.memory_space<vmem>>, vector<8x32xbf16>
      %32 = vector.extract_strided_slice %16 {offsets = [0, 0], sizes = [8, 32], strides = [1, 1]} : vector<8x128xbf16> to vector<8x32xbf16>
      %33 = vector.extract_strided_slice %18 {offsets = [0, 0], sizes = [8, 32], strides = [1, 1]} : vector<8x128xbf16> to vector<8x32xbf16>
      %cst_12 = arith.constant dense<0.000000e+00> : vector<8x8xf32>
      %34 = tpu.matmul %31, %32, %cst_12 {dimension_numbers = #tpu.dot_dimension_numbers<[1], [1], [0], [0], [0, 0, 1, 0], [], []>} : vector<8x32xbf16>, vector<8x32xbf16>, vector<8x8xf32> -> vector<8x8xf32>
      %35 = arith.addf %34, %30 : vector<8x8xf32>
      %c0_13 = arith.constant 0 : index
      %c0_14 = arith.constant 0 : index
      %c0_15 = arith.constant 0 : index
      %36 = vector.load %arg19[%c0_13, %c0_14, %c0_15] : memref<4x8x1xf32, #tpu.memory_space<vmem>>, vector<1x8x1xf32>
      %37 = vector.shape_cast %36 : vector<1x8x1xf32> to vector<8x1xf32>
      %cst_16 = arith.constant dense<0xFF800000> : vector<8xf32>
      %38 = vector.multi_reduction <maximumf>, %35, %cst_16 [1] : vector<8x8xf32> to vector<8xf32>
      %39 = vector.shape_cast %38 : vector<8xf32> to vector<8x1xf32>
      %40 = arith.maximumf %37, %39 : vector<8x1xf32>
      %41 = arith.subf %37, %40 : vector<8x1xf32>
      %42 = math.exp %41 : vector<8x1xf32>
      %43 = vector.broadcast %40 : vector<8x1xf32> to vector<8x8xf32>
      %44 = arith.subf %35, %43 : vector<8x8xf32>
      %45 = math.exp %44 : vector<8x8xf32>
      %c0_17 = arith.constant 0 : index
      %c0_18 = arith.constant 0 : index
      %c0_19 = arith.constant 0 : index
      %46 = vector.load %arg20[%c0_17, %c0_18, %c0_19] : memref<4x8x1xf32, #tpu.memory_space<vmem>>, vector<1x8x1xf32>
      %47 = vector.shape_cast %46 : vector<1x8x1xf32> to vector<8x1xf32>
      %48 = arith.mulf %42, %47 : vector<8x1xf32>
      %cst_20 = arith.constant dense<0.000000e+00> : vector<8xf32>
      %49 = vector.multi_reduction <add>, %45, %cst_20 [1] : vector<8x8xf32> to vector<8xf32>
      %50 = vector.shape_cast %49 : vector<8xf32> to vector<8x1xf32>
      %51 = arith.addf %48, %50 : vector<8x1xf32>
      %c0_21 = arith.constant 0 : index
      %c0_22 = arith.constant 0 : index
      %c0_23 = arith.constant 0 : index
      %52 = vector.load %arg20[%c0_21, %c0_22, %c0_23] : memref<4x8x1xf32, #tpu.memory_space<vmem>>, vector<1x8x1xf32>
      %53 = vector.shape_cast %52 : vector<1x8x1xf32> to vector<8x1xf32>
      %54 = vector.shape_cast %51 : vector<8x1xf32> to vector<1x8x1xf32>
      tpu.vector_store %arg20[%c0_21, %c0_22, %c0_23], %54 {strides = array<i32>} : memref<4x8x1xf32, #tpu.memory_space<vmem>>, vector<1x8x1xf32>,
      %c0_24 = arith.constant 0 : index
      %c0_25 = arith.constant 0 : index
      %c0_26 = arith.constant 0 : index
      %55 = vector.load %arg18[%c0_24, %c0_25, %c0_26] : memref<4x8x32xf32, #tpu.memory_space<vmem>>, vector<1x8x32xf32>
      %56 = vector.shape_cast %55 : vector<1x8x32xf32> to vector<8x32xf32>
      %57 = vector.broadcast %42 : vector<8x1xf32> to vector<8x32xf32>
      %58 = arith.mulf %57, %56 : vector<8x32xf32>
      %59 = arith.truncf %45 : vector<8x8xf32> to vector<8x8xbf16>
      %cst_27 = arith.constant dense<0.000000e+00> : vector<8x32xf32>
      %60 = tpu.matmul %59, %33, %cst_27 {dimension_numbers = #tpu.dot_dimension_numbers<[1], [0], [0], [1], [0, 0, 1, 1], [], []>} : vector<8x8xbf16>, vector<8x32xbf16>, vector<8x32xf32> -> vector<8x32xf32>
      %61 = arith.addf %58, %60 : vector<8x32xf32>
      %c0_28 = arith.constant 0 : index
      %c0_29 = arith.constant 0 : index
      %c0_30 = arith.constant 0 : index
      %62 = vector.load %arg18[%c0_28, %c0_29, %c0_30] : memref<4x8x32xf32, #tpu.memory_space<vmem>>, vector<1x8x32xf32>
      %63 = vector.shape_cast %62 : vector<1x8x32xf32> to vector<8x32xf32>
      %64 = vector.shape_cast %61 : vector<8x32xf32> to vector<1x8x32xf32>
      tpu.vector_store %arg18[%c0_28, %c0_29, %c0_30], %64 {strides = array<i32>} : memref<4x8x32xf32, #tpu.memory_space<vmem>>, vector<1x8x32xf32>,
      %c0_31 = arith.constant 0 : index
      %c0_32 = arith.constant 0 : index
      %c0_33 = arith.constant 0 : index
      %65 = vector.load %arg19[%c0_31, %c0_32, %c0_33] : memref<4x8x1xf32, #tpu.memory_space<vmem>>, vector<1x8x1xf32>
      %66 = vector.shape_cast %65 : vector<1x8x1xf32> to vector<8x1xf32>
      %67 = vector.shape_cast %40 : vector<8x1xf32> to vector<1x8x1xf32>
      tpu.vector_store %arg19[%c0_31, %c0_32, %c0_33], %67 {strides = array<i32>} : memref<4x8x1xf32, #tpu.memory_space<vmem>>, vector<1x8x1xf32>,
      %c0_34 = arith.constant 0 : index
      %c32 = arith.constant 32 : index
      %68 = vector.load %arg17[%c0_34, %c32] : memref<8x128xbf16, #tpu.memory_space<vmem>>, vector<8x32xbf16>
      %69 = vector.extract_strided_slice %16 {offsets = [0, 32], sizes = [8, 32], strides = [1, 1]} : vector<8x128xbf16> to vector<8x32xbf16>
      %70 = vector.extract_strided_slice %18 {offsets = [0, 32], sizes = [8, 32], strides = [1, 1]} : vector<8x128xbf16> to vector<8x32xbf16>
      %cst_35 = arith.constant dense<0.000000e+00> : vector<8x8xf32>
      %71 = tpu.matmul %68, %69, %cst_35 {dimension_numbers = #tpu.dot_dimension_numbers<[1], [1], [0], [0], [0, 0, 1, 0], [], []>} : vector<8x32xbf16>, vector<8x32xbf16>, vector<8x8xf32> -> vector<8x8xf32>
      %72 = arith.addf %71, %30 : vector<8x8xf32>
      %c1 = arith.constant 1 : index
      %c0_36 = arith.constant 0 : index
      %c0_37 = arith.constant 0 : index
      %73 = vector.load %arg19[%c1, %c0_36, %c0_37] : memref<4x8x1xf32, #tpu.memory_space<vmem>>, vector<1x8x1xf32>
      %74 = vector.shape_cast %73 : vector<1x8x1xf32> to vector<8x1xf32>
      %cst_38 = arith.constant dense<0xFF800000> : vector<8xf32>
      %75 = vector.multi_reduction <maximumf>, %72, %cst_38 [1] : vector<8x8xf32> to vector<8xf32>
      %76 = vector.shape_cast %75 : vector<8xf32> to vector<8x1xf32>
      %77 = arith.maximumf %74, %76 : vector<8x1xf32>
      %78 = arith.subf %74, %77 : vector<8x1xf32>
      %79 = math.exp %78 : vector<8x1xf32>
      %80 = vector.broadcast %77 : vector<8x1xf32> to vector<8x8xf32>
      %81 = arith.subf %72, %80 : vector<8x8xf32>
      %82 = math.exp %81 : vector<8x8xf32>
      %c1_39 = arith.constant 1 : index
      %c0_40 = arith.constant 0 : index
      %c0_41 = arith.constant 0 : index
      %83 = vector.load %arg20[%c1_39, %c0_40, %c0_41] : memref<4x8x1xf32, #tpu.memory_space<vmem>>, vector<1x8x1xf32>
      %84 = vector.shape_cast %83 : vector<1x8x1xf32> to vector<8x1xf32>
      %85 = arith.mulf %79, %84 : vector<8x1xf32>
      %cst_42 = arith.constant dense<0.000000e+00> : vector<8xf32>
      %86 = vector.multi_reduction <add>, %82, %cst_42 [1] : vector<8x8xf32> to vector<8xf32>
      %87 = vector.shape_cast %86 : vector<8xf32> to vector<8x1xf32>
      %88 = arith.addf %85, %87 : vector<8x1xf32>
      %c1_43 = arith.constant 1 : index
      %c0_44 = arith.constant 0 : index
      %c0_45 = arith.constant 0 : index
      %89 = vector.load %arg20[%c1_43, %c0_44, %c0_45] : memref<4x8x1xf32, #tpu.memory_space<vmem>>, vector<1x8x1xf32>
      %90 = vector.shape_cast %89 : vector<1x8x1xf32> to vector<8x1xf32>
      %91 = vector.shape_cast %88 : vector<8x1xf32> to vector<1x8x1xf32>
      tpu.vector_store %arg20[%c1_43, %c0_44, %c0_45], %91 {strides = array<i32>} : memref<4x8x1xf32, #tpu.memory_space<vmem>>, vector<1x8x1xf32>,
      %c1_46 = arith.constant 1 : index
      %c0_47 = arith.constant 0 : index
      %c0_48 = arith.constant 0 : index
      %92 = vector.load %arg18[%c1_46, %c0_47, %c0_48] : memref<4x8x32xf32, #tpu.memory_space<vmem>>, vector<1x8x32xf32>
      %93 = vector.shape_cast %92 : vector<1x8x32xf32> to vector<8x32xf32>
      %94 = vector.broadcast %79 : vector<8x1xf32> to vector<8x32xf32>
      %95 = arith.mulf %94, %93 : vector<8x32xf32>
      %96 = arith.truncf %82 : vector<8x8xf32> to vector<8x8xbf16>
      %cst_49 = arith.constant dense<0.000000e+00> : vector<8x32xf32>
      %97 = tpu.matmul %96, %70, %cst_49 {dimension_numbers = #tpu.dot_dimension_numbers<[1], [0], [0], [1], [0, 0, 1, 1], [], []>} : vector<8x8xbf16>, vector<8x32xbf16>, vector<8x32xf32> -> vector<8x32xf32>
      %98 = arith.addf %95, %97 : vector<8x32xf32>
      %c1_50 = arith.constant 1 : index
      %c0_51 = arith.constant 0 : index
      %c0_52 = arith.constant 0 : index
      %99 = vector.load %arg18[%c1_50, %c0_51, %c0_52] : memref<4x8x32xf32, #tpu.memory_space<vmem>>, vector<1x8x32xf32>
      %100 = vector.shape_cast %99 : vector<1x8x32xf32> to vector<8x32xf32>
      %101 = vector.shape_cast %98 : vector<8x32xf32> to vector<1x8x32xf32>
      tpu.vector_store %arg18[%c1_50, %c0_51, %c0_52], %101 {strides = array<i32>} : memref<4x8x32xf32, #tpu.memory_space<vmem>>, vector<1x8x32xf32>,
      %c1_53 = arith.constant 1 : index
      %c0_54 = arith.constant 0 : index
      %c0_55 = arith.constant 0 : index
      %102 = vector.load %arg19[%c1_53, %c0_54, %c0_55] : memref<4x8x1xf32, #tpu.memory_space<vmem>>, vector<1x8x1xf32>
      %103 = vector.shape_cast %102 : vector<1x8x1xf32> to vector<8x1xf32>
      %104 = vector.shape_cast %77 : vector<8x1xf32> to vector<1x8x1xf32>
      tpu.vector_store %arg19[%c1_53, %c0_54, %c0_55], %104 {strides = array<i32>} : memref<4x8x1xf32, #tpu.memory_space<vmem>>, vector<1x8x1xf32>,
      %c0_56 = arith.constant 0 : index
      %c64 = arith.constant 64 : index
      %105 = vector.load %arg17[%c0_56, %c64] : memref<8x128xbf16, #tpu.memory_space<vmem>>, vector<8x32xbf16>
      %106 = vector.extract_strided_slice %16 {offsets = [0, 64], sizes = [8, 32], strides = [1, 1]} : vector<8x128xbf16> to vector<8x32xbf16>
      %107 = vector.extract_strided_slice %18 {offsets = [0, 64], sizes = [8, 32], strides = [1, 1]} : vector<8x128xbf16> to vector<8x32xbf16>
      %cst_57 = arith.constant dense<0.000000e+00> : vector<8x8xf32>
      %108 = tpu.matmul %105, %106, %cst_57 {dimension_numbers = #tpu.dot_dimension_numbers<[1], [1], [0], [0], [0, 0, 1, 0], [], []>} : vector<8x32xbf16>, vector<8x32xbf16>, vector<8x8xf32> -> vector<8x8xf32>
      %109 = arith.addf %108, %30 : vector<8x8xf32>
      %c2 = arith.constant 2 : index
      %c0_58 = arith.constant 0 : index
      %c0_59 = arith.constant 0 : index
      %110 = vector.load %arg19[%c2, %c0_58, %c0_59] : memref<4x8x1xf32, #tpu.memory_space<vmem>>, vector<1x8x1xf32>
      %111 = vector.shape_cast %110 : vector<1x8x1xf32> to vector<8x1xf32>
      %cst_60 = arith.constant dense<0xFF800000> : vector<8xf32>
      %112 = vector.multi_reduction <maximumf>, %109, %cst_60 [1] : vector<8x8xf32> to vector<8xf32>
      %113 = vector.shape_cast %112 : vector<8xf32> to vector<8x1xf32>
      %114 = arith.maximumf %111, %113 : vector<8x1xf32>
      %115 = arith.subf %111, %114 : vector<8x1xf32>
      %116 = math.exp %115 : vector<8x1xf32>
      %117 = vector.broadcast %114 : vector<8x1xf32> to vector<8x8xf32>
      %118 = arith.subf %109, %117 : vector<8x8xf32>
      %119 = math.exp %118 : vector<8x8xf32>
      %c2_61 = arith.constant 2 : index
      %c0_62 = arith.constant 0 : index
      %c0_63 = arith.constant 0 : index
      %120 = vector.load %arg20[%c2_61, %c0_62, %c0_63] : memref<4x8x1xf32, #tpu.memory_space<vmem>>, vector<1x8x1xf32>
      %121 = vector.shape_cast %120 : vector<1x8x1xf32> to vector<8x1xf32>
      %122 = arith.mulf %116, %121 : vector<8x1xf32>
      %cst_64 = arith.constant dense<0.000000e+00> : vector<8xf32>
      %123 = vector.multi_reduction <add>, %119, %cst_64 [1] : vector<8x8xf32> to vector<8xf32>
      %124 = vector.shape_cast %123 : vector<8xf32> to vector<8x1xf32>
      %125 = arith.addf %122, %124 : vector<8x1xf32>
      %c2_65 = arith.constant 2 : index
      %c0_66 = arith.constant 0 : index
      %c0_67 = arith.constant 0 : index
      %126 = vector.load %arg20[%c2_65, %c0_66, %c0_67] : memref<4x8x1xf32, #tpu.memory_space<vmem>>, vector<1x8x1xf32>
      %127 = vector.shape_cast %126 : vector<1x8x1xf32> to vector<8x1xf32>
      %128 = vector.shape_cast %125 : vector<8x1xf32> to vector<1x8x1xf32>
      tpu.vector_store %arg20[%c2_65, %c0_66, %c0_67], %128 {strides = array<i32>} : memref<4x8x1xf32, #tpu.memory_space<vmem>>, vector<1x8x1xf32>,
      %c2_68 = arith.constant 2 : index
      %c0_69 = arith.constant 0 : index
      %c0_70 = arith.constant 0 : index
      %129 = vector.load %arg18[%c2_68, %c0_69, %c0_70] : memref<4x8x32xf32, #tpu.memory_space<vmem>>, vector<1x8x32xf32>
      %130 = vector.shape_cast %129 : vector<1x8x32xf32> to vector<8x32xf32>
      %131 = vector.broadcast %116 : vector<8x1xf32> to vector<8x32xf32>
      %132 = arith.mulf %131, %130 : vector<8x32xf32>
      %133 = arith.truncf %119 : vector<8x8xf32> to vector<8x8xbf16>
      %cst_71 = arith.constant dense<0.000000e+00> : vector<8x32xf32>
      %134 = tpu.matmul %133, %107, %cst_71 {dimension_numbers = #tpu.dot_dimension_numbers<[1], [0], [0], [1], [0, 0, 1, 1], [], []>} : vector<8x8xbf16>, vector<8x32xbf16>, vector<8x32xf32> -> vector<8x32xf32>
      %135 = arith.addf %132, %134 : vector<8x32xf32>
      %c2_72 = arith.constant 2 : index
      %c0_73 = arith.constant 0 : index
      %c0_74 = arith.constant 0 : index
      %136 = vector.load %arg18[%c2_72, %c0_73, %c0_74] : memref<4x8x32xf32, #tpu.memory_space<vmem>>, vector<1x8x32xf32>
      %137 = vector.shape_cast %136 : vector<1x8x32xf32> to vector<8x32xf32>
      %138 = vector.shape_cast %135 : vector<8x32xf32> to vector<1x8x32xf32>
      tpu.vector_store %arg18[%c2_72, %c0_73, %c0_74], %138 {strides = array<i32>} : memref<4x8x32xf32, #tpu.memory_space<vmem>>, vector<1x8x32xf32>,
      %c2_75 = arith.constant 2 : index
      %c0_76 = arith.constant 0 : index
      %c0_77 = arith.constant 0 : index
      %139 = vector.load %arg19[%c2_75, %c0_76, %c0_77] : memref<4x8x1xf32, #tpu.memory_space<vmem>>, vector<1x8x1xf32>
      %140 = vector.shape_cast %139 : vector<1x8x1xf32> to vector<8x1xf32>
      %141 = vector.shape_cast %114 : vector<8x1xf32> to vector<1x8x1xf32>
      tpu.vector_store %arg19[%c2_75, %c0_76, %c0_77], %141 {strides = array<i32>} : memref<4x8x1xf32, #tpu.memory_space<vmem>>, vector<1x8x1xf32>,
      %c0_78 = arith.constant 0 : index
      %c96 = arith.constant 96 : index
      %142 = vector.load %arg17[%c0_78, %c96] : memref<8x128xbf16, #tpu.memory_space<vmem>>, vector<8x32xbf16>
      %143 = vector.extract_strided_slice %16 {offsets = [0, 96], sizes = [8, 32], strides = [1, 1]} : vector<8x128xbf16> to vector<8x32xbf16>
      %144 = vector.extract_strided_slice %18 {offsets = [0, 96], sizes = [8, 32], strides = [1, 1]} : vector<8x128xbf16> to vector<8x32xbf16>
      %cst_79 = arith.constant dense<0.000000e+00> : vector<8x8xf32>
      %145 = tpu.matmul %142, %143, %cst_79 {dimension_numbers = #tpu.dot_dimension_numbers<[1], [1], [0], [0], [0, 0, 1, 0], [], []>} : vector<8x32xbf16>, vector<8x32xbf16>, vector<8x8xf32> -> vector<8x8xf32>
      %146 = arith.addf %145, %30 : vector<8x8xf32>
      %c3 = arith.constant 3 : index
      %c0_80 = arith.constant 0 : index
      %c0_81 = arith.constant 0 : index
      %147 = vector.load %arg19[%c3, %c0_80, %c0_81] : memref<4x8x1xf32, #tpu.memory_space<vmem>>, vector<1x8x1xf32>
      %148 = vector.shape_cast %147 : vector<1x8x1xf32> to vector<8x1xf32>
      %cst_82 = arith.constant dense<0xFF800000> : vector<8xf32>
      %149 = vector.multi_reduction <maximumf>, %146, %cst_82 [1] : vector<8x8xf32> to vector<8xf32>
      %150 = vector.shape_cast %149 : vector<8xf32> to vector<8x1xf32>
      %151 = arith.maximumf %148, %150 : vector<8x1xf32>
      %152 = arith.subf %148, %151 : vector<8x1xf32>
      %153 = math.exp %152 : vector<8x1xf32>
      %154 = vector.broadcast %151 : vector<8x1xf32> to vector<8x8xf32>
      %155 = arith.subf %146, %154 : vector<8x8xf32>
      %156 = math.exp %155 : vector<8x8xf32>
      %c3_83 = arith.constant 3 : index
      %c0_84 = arith.constant 0 : index
      %c0_85 = arith.constant 0 : index
      %157 = vector.load %arg20[%c3_83, %c0_84, %c0_85] : memref<4x8x1xf32, #tpu.memory_space<vmem>>, vector<1x8x1xf32>
      %158 = vector.shape_cast %157 : vector<1x8x1xf32> to vector<8x1xf32>
      %159 = arith.mulf %153, %158 : vector<8x1xf32>
      %cst_86 = arith.constant dense<0.000000e+00> : vector<8xf32>
      %160 = vector.multi_reduction <add>, %156, %cst_86 [1] : vector<8x8xf32> to vector<8xf32>
      %161 = vector.shape_cast %160 : vector<8xf32> to vector<8x1xf32>
      %162 = arith.addf %159, %161 : vector<8x1xf32>
      %c3_87 = arith.constant 3 : index
      %c0_88 = arith.constant 0 : index
      %c0_89 = arith.constant 0 : index
      %163 = vector.load %arg20[%c3_87, %c0_88, %c0_89] : memref<4x8x1xf32, #tpu.memory_space<vmem>>, vector<1x8x1xf32>
      %164 = vector.shape_cast %163 : vector<1x8x1xf32> to vector<8x1xf32>
      %165 = vector.shape_cast %162 : vector<8x1xf32> to vector<1x8x1xf32>
      tpu.vector_store %arg20[%c3_87, %c0_88, %c0_89], %165 {strides = array<i32>} : memref<4x8x1xf32, #tpu.memory_space<vmem>>, vector<1x8x1xf32>,
      %c3_90 = arith.constant 3 : index
      %c0_91 = arith.constant 0 : index
      %c0_92 = arith.constant 0 : index
      %166 = vector.load %arg18[%c3_90, %c0_91, %c0_92] : memref<4x8x32xf32, #tpu.memory_space<vmem>>, vector<1x8x32xf32>
      %167 = vector.shape_cast %166 : vector<1x8x32xf32> to vector<8x32xf32>
      %168 = vector.broadcast %153 : vector<8x1xf32> to vector<8x32xf32>
      %169 = arith.mulf %168, %167 : vector<8x32xf32>
      %170 = arith.truncf %156 : vector<8x8xf32> to vector<8x8xbf16>
      %cst_93 = arith.constant dense<0.000000e+00> : vector<8x32xf32>
      %171 = tpu.matmul %170, %144, %cst_93 {dimension_numbers = #tpu.dot_dimension_numbers<[1], [0], [0], [1], [0, 0, 1, 1], [], []>} : vector<8x8xbf16>, vector<8x32xbf16>, vector<8x32xf32> -> vector<8x32xf32>
      %172 = arith.addf %169, %171 : vector<8x32xf32>
      %c3_94 = arith.constant 3 : index
      %c0_95 = arith.constant 0 : index
      %c0_96 = arith.constant 0 : index
      %173 = vector.load %arg18[%c3_94, %c0_95, %c0_96] : memref<4x8x32xf32, #tpu.memory_space<vmem>>, vector<1x8x32xf32>
      %174 = vector.shape_cast %173 : vector<1x8x32xf32> to vector<8x32xf32>
      %175 = vector.shape_cast %172 : vector<8x32xf32> to vector<1x8x32xf32>
      tpu.vector_store %arg18[%c3_94, %c0_95, %c0_96], %175 {strides = array<i32>} : memref<4x8x32xf32, #tpu.memory_space<vmem>>, vector<1x8x32xf32>,
      %c3_97 = arith.constant 3 : index
      %c0_98 = arith.constant 0 : index
      %c0_99 = arith.constant 0 : index
      %176 = vector.load %arg19[%c3_97, %c0_98, %c0_99] : memref<4x8x1xf32, #tpu.memory_space<vmem>>, vector<1x8x1xf32>
      %177 = vector.shape_cast %176 : vector<1x8x1xf32> to vector<8x1xf32>
      %178 = vector.shape_cast %151 : vector<8x1xf32> to vector<1x8x1xf32>
      tpu.vector_store %arg19[%c3_97, %c0_98, %c0_99], %178 {strides = array<i32>} : memref<4x8x1xf32, #tpu.memory_space<vmem>>, vector<1x8x1xf32>,
    } else {
    }
    %6 = arith.cmpi eq, %arg2, %arg1 : i32
    %7 = arith.extui %6 : i1 to i32
    %c0_i32_2 = arith.constant 0 : i32
    %8 = arith.cmpi ne, %7, %c0_i32_2 : i32
    scf.if %8 {
      %c0 = arith.constant 0 : index
      %c0_3 = arith.constant 0 : index
      %c0_4 = arith.constant 0 : index
      %9 = vector.load %arg3[%c0, %c0_3, %c0_4] : memref<1x8x32xf32, #tpu.memory_space<vmem>>, vector<1x8x32xf32>
      %10 = vector.shape_cast %9 : vector<1x8x32xf32> to vector<8x32xf32>
      %cst = arith.constant 0.000000e+00 : f32
      %11 = vector.broadcast %cst : f32 to vector<8x32xf32>
      %c0_5 = arith.constant 0 : index
      %c0_6 = arith.constant 0 : index
      %c0_7 = arith.constant 0 : index
      %12 = vector.load %arg20[%c0_5, %c0_6, %c0_7] : memref<4x8x1xf32, #tpu.memory_space<vmem>>, vector<1x8x1xf32>
      %13 = vector.shape_cast %12 : vector<1x8x1xf32> to vector<8x1xf32>
      %14 = tpu.reciprocal %13 {approx = true} : vector<8x1xf32> -> vector<8x1xf32>
      %c0_8 = arith.constant 0 : index
      %c0_9 = arith.constant 0 : index
      %c0_10 = arith.constant 0 : index
      %15 = vector.load %arg18[%c0_8, %c0_9, %c0_10] : memref<4x8x32xf32, #tpu.memory_space<vmem>>, vector<1x8x32xf32>
      %16 = vector.shape_cast %15 : vector<1x8x32xf32> to vector<8x32xf32>
      %17 = vector.broadcast %14 : vector<8x1xf32> to vector<8x32xf32>
      %18 = arith.mulf %16, %17 : vector<8x32xf32>
      %19 = arith.truncf %18 : vector<8x32xf32> to vector<8x32xbf16>
      %c0_11 = arith.constant 0 : index
      %c0_12 = arith.constant 0 : index
      %20 = vector.load %arg7[%c0_11, %c0_12] : memref<128x32xf32, #tpu.memory_space<vmem>>, vector<32x32xf32>
      %21 = arith.truncf %20 : vector<32x32xf32> to vector<32x32xbf16>
      %cst_13 = arith.constant dense<0.000000e+00> : vector<8x32xf32>
      %22 = tpu.matmul %19, %21, %cst_13 {dimension_numbers = #tpu.dot_dimension_numbers<[1], [0], [0], [1], [0, 0, 1, 1], [], []>} : vector<8x32xbf16>, vector<32x32xbf16>, vector<8x32xf32> -> vector<8x32xf32>
      %23 = arith.addf %11, %22 : vector<8x32xf32>
      %c1 = arith.constant 1 : index
      %c0_14 = arith.constant 0 : index
      %c0_15 = arith.constant 0 : index
      %24 = vector.load %arg20[%c1, %c0_14, %c0_15] : memref<4x8x1xf32, #tpu.memory_space<vmem>>, vector<1x8x1xf32>
      %25 = vector.shape_cast %24 : vector<1x8x1xf32> to vector<8x1xf32>
      %26 = tpu.reciprocal %25 {approx = true} : vector<8x1xf32> -> vector<8x1xf32>
      %c1_16 = arith.constant 1 : index
      %c0_17 = arith.constant 0 : index
      %c0_18 = arith.constant 0 : index
      %27 = vector.load %arg18[%c1_16, %c0_17, %c0_18] : memref<4x8x32xf32, #tpu.memory_space<vmem>>, vector<1x8x32xf32>
      %28 = vector.shape_cast %27 : vector<1x8x32xf32> to vector<8x32xf32>
      %29 = vector.broadcast %26 : vector<8x1xf32> to vector<8x32xf32>
      %30 = arith.mulf %28, %29 : vector<8x32xf32>
      %31 = arith.truncf %30 : vector<8x32xf32> to vector<8x32xbf16>
      %c32 = arith.constant 32 : index
      %c0_19 = arith.constant 0 : index
      %32 = vector.load %arg7[%c32, %c0_19] : memref<128x32xf32, #tpu.memory_space<vmem>>, vector<32x32xf32>
      %33 = arith.truncf %32 : vector<32x32xf32> to vector<32x32xbf16>
      %cst_20 = arith.constant dense<0.000000e+00> : vector<8x32xf32>
      %34 = tpu.matmul %31, %33, %cst_20 {dimension_numbers = #tpu.dot_dimension_numbers<[1], [0], [0], [1], [0, 0, 1, 1], [], []>} : vector<8x32xbf16>, vector<32x32xbf16>, vector<8x32xf32> -> vector<8x32xf32>
      %35 = arith.addf %23, %34 : vector<8x32xf32>
      %c2 = arith.constant 2 : index
      %c0_21 = arith.constant 0 : index
      %c0_22 = arith.constant 0 : index
      %36 = vector.load %arg20[%c2, %c0_21, %c0_22] : memref<4x8x1xf32, #tpu.memory_space<vmem>>, vector<1x8x1xf32>
      %37 = vector.shape_cast %36 : vector<1x8x1xf32> to vector<8x1xf32>
      %38 = tpu.reciprocal %37 {approx = true} : vector<8x1xf32> -> vector<8x1xf32>
      %c2_23 = arith.constant 2 : index
      %c0_24 = arith.constant 0 : index
      %c0_25 = arith.constant 0 : index
      %39 = vector.load %arg18[%c2_23, %c0_24, %c0_25] : memref<4x8x32xf32, #tpu.memory_space<vmem>>, vector<1x8x32xf32>
      %40 = vector.shape_cast %39 : vector<1x8x32xf32> to vector<8x32xf32>
      %41 = vector.broadcast %38 : vector<8x1xf32> to vector<8x32xf32>
      %42 = arith.mulf %40, %41 : vector<8x32xf32>
      %43 = arith.truncf %42 : vector<8x32xf32> to vector<8x32xbf16>
      %c64 = arith.constant 64 : index
      %c0_26 = arith.constant 0 : index
      %44 = vector.load %arg7[%c64, %c0_26] : memref<128x32xf32, #tpu.memory_space<vmem>>, vector<32x32xf32>
      %45 = arith.truncf %44 : vector<32x32xf32> to vector<32x32xbf16>
      %cst_27 = arith.constant dense<0.000000e+00> : vector<8x32xf32>
      %46 = tpu.matmul %43, %45, %cst_27 {dimension_numbers = #tpu.dot_dimension_numbers<[1], [0], [0], [1], [0, 0, 1, 1], [], []>} : vector<8x32xbf16>, vector<32x32xbf16>, vector<8x32xf32> -> vector<8x32xf32>
      %47 = arith.addf %35, %46 : vector<8x32xf32>
      %c3 = arith.constant 3 : index
      %c0_28 = arith.constant 0 : index
      %c0_29 = arith.constant 0 : index
      %48 = vector.load %arg20[%c3, %c0_28, %c0_29] : memref<4x8x1xf32, #tpu.memory_space<vmem>>, vector<1x8x1xf32>
      %49 = vector.shape_cast %48 : vector<1x8x1xf32> to vector<8x1xf32>
      %50 = tpu.reciprocal %49 {approx = true} : vector<8x1xf32> -> vector<8x1xf32>
      %c3_30 = arith.constant 3 : index
      %c0_31 = arith.constant 0 : index
      %c0_32 = arith.constant 0 : index
      %51 = vector.load %arg18[%c3_30, %c0_31, %c0_32] : memref<4x8x32xf32, #tpu.memory_space<vmem>>, vector<1x8x32xf32>
      %52 = vector.shape_cast %51 : vector<1x8x32xf32> to vector<8x32xf32>
      %53 = vector.broadcast %50 : vector<8x1xf32> to vector<8x32xf32>
      %54 = arith.mulf %52, %53 : vector<8x32xf32>
      %55 = arith.truncf %54 : vector<8x32xf32> to vector<8x32xbf16>
      %c96 = arith.constant 96 : index
      %c0_33 = arith.constant 0 : index
      %56 = vector.load %arg7[%c96, %c0_33] : memref<128x32xf32, #tpu.memory_space<vmem>>, vector<32x32xf32>
      %57 = arith.truncf %56 : vector<32x32xf32> to vector<32x32xbf16>
      %cst_34 = arith.constant dense<0.000000e+00> : vector<8x32xf32>
      %58 = tpu.matmul %55, %57, %cst_34 {dimension_numbers = #tpu.dot_dimension_numbers<[1], [0], [0], [1], [0, 0, 1, 1], [], []>} : vector<8x32xbf16>, vector<32x32xbf16>, vector<8x32xf32> -> vector<8x32xf32>
      %59 = arith.addf %47, %58 : vector<8x32xf32>
      %60 = arith.addf %59, %10 : vector<8x32xf32>
      %c0_35 = arith.constant 0 : index
      %c0_36 = arith.constant 0 : index
      %61 = vector.load %arg8[%c0_35, %c0_36] : memref<1x32xf32, #tpu.memory_space<vmem>>, vector<1x32xf32>
      %c0_37 = arith.constant 0 : index
      %c0_38 = arith.constant 0 : index
      %62 = vector.load %arg9[%c0_37, %c0_38] : memref<1x32xf32, #tpu.memory_space<vmem>>, vector<1x32xf32>
      %cst_39 = arith.constant dense<0.000000e+00> : vector<8xf32>
      %63 = vector.multi_reduction <add>, %60, %cst_39 [1] : vector<8x32xf32> to vector<8xf32>
      %64 = vector.shape_cast %63 : vector<8xf32> to vector<8x1xf32>
      %cst_40 = arith.constant 3.200000e+01 : f32
      %65 = vector.broadcast %cst_40 : f32 to vector<8x1xf32>
      %66 = arith.divf %64, %65 : vector<8x1xf32>
      %67 = vector.broadcast %66 : vector<8x1xf32> to vector<8x32xf32>
      %68 = arith.subf %60, %67 : vector<8x32xf32>
      %69 = arith.mulf %68, %68 : vector<8x32xf32>
      %cst_41 = arith.constant dense<0.000000e+00> : vector<8xf32>
      %70 = vector.multi_reduction <add>, %69, %cst_41 [1] : vector<8x32xf32> to vector<8xf32>
      %71 = vector.shape_cast %70 : vector<8xf32> to vector<8x1xf32>
      %cst_42 = arith.constant 3.200000e+01 : f32
      %72 = vector.broadcast %cst_42 : f32 to vector<8x1xf32>
      %73 = arith.divf %71, %72 : vector<8x1xf32>
      %74 = vector.broadcast %66 : vector<8x1xf32> to vector<8x32xf32>
      %75 = arith.subf %60, %74 : vector<8x32xf32>
      %cst_43 = arith.constant 9.99999974E-6 : f32
      %76 = vector.broadcast %cst_43 : f32 to vector<8x1xf32>
      %77 = arith.addf %73, %76 : vector<8x1xf32>
      %78 = math.rsqrt %77 : vector<8x1xf32>
      %79 = vector.broadcast %78 : vector<8x1xf32> to vector<8x32xf32>
      %80 = arith.mulf %75, %79 : vector<8x32xf32>
      %81 = vector.broadcast %61 : vector<1x32xf32> to vector<8x32xf32>
      %82 = arith.mulf %80, %81 : vector<8x32xf32>
      %83 = vector.broadcast %62 : vector<1x32xf32> to vector<8x32xf32>
      %84 = arith.addf %82, %83 : vector<8x32xf32>
      %85 = arith.truncf %84 : vector<8x32xf32> to vector<8x32xbf16>
      %c0_44 = arith.constant 0 : index
      %c0_45 = arith.constant 0 : index
      %86 = vector.load %arg10[%c0_44, %c0_45] : memref<32x128xf32, #tpu.memory_space<vmem>>, vector<32x128xf32>
      %87 = arith.truncf %86 : vector<32x128xf32> to vector<32x128xbf16>
      %cst_46 = arith.constant dense<0.000000e+00> : vector<8x128xf32>
      %88 = tpu.matmul %85, %87, %cst_46 {dimension_numbers = #tpu.dot_dimension_numbers<[1], [0], [0], [1], [0, 0, 1, 1], [], []>} : vector<8x32xbf16>, vector<32x128xbf16>, vector<8x128xf32> -> vector<8x128xf32>
      %c0_47 = arith.constant 0 : index
      %c0_48 = arith.constant 0 : index
      %89 = vector.load %arg11[%c0_47, %c0_48] : memref<1x128xf32, #tpu.memory_space<vmem>>, vector<1x128xf32>
      %90 = vector.broadcast %89 : vector<1x128xf32> to vector<8x128xf32>
      %91 = arith.addf %88, %90 : vector<8x128xf32>
      %cst_49 = arith.constant 0.000000e+00 : f32
      %92 = vector.broadcast %cst_49 : f32 to vector<8x128xf32>
      %93 = arith.maximumf %91, %92 : vector<8x128xf32>
      %94 = arith.truncf %93 : vector<8x128xf32> to vector<8x128xbf16>
      %c0_50 = arith.constant 0 : index
      %c0_51 = arith.constant 0 : index
      %95 = vector.load %arg12[%c0_50, %c0_51] : memref<128x32xf32, #tpu.memory_space<vmem>>, vector<128x32xf32>
      %96 = arith.truncf %95 : vector<128x32xf32> to vector<128x32xbf16>
      %cst_52 = arith.constant dense<0.000000e+00> : vector<8x32xf32>
      %97 = tpu.matmul %94, %96, %cst_52 {dimension_numbers = #tpu.dot_dimension_numbers<[1], [0], [0], [1], [0, 0, 1, 1], [], []>} : vector<8x128xbf16>, vector<128x32xbf16>, vector<8x32xf32> -> vector<8x32xf32>
      %c0_53 = arith.constant 0 : index
      %c0_54 = arith.constant 0 : index
      %98 = vector.load %arg13[%c0_53, %c0_54] : memref<1x32xf32, #tpu.memory_space<vmem>>, vector<1x32xf32>
      %99 = vector.broadcast %98 : vector<1x32xf32> to vector<8x32xf32>
      %100 = arith.addf %97, %99 : vector<8x32xf32>
      %101 = arith.addf %100, %84 : vector<8x32xf32>
      %c0_55 = arith.constant 0 : index
      %c0_56 = arith.constant 0 : index
      %102 = vector.load %arg14[%c0_55, %c0_56] : memref<1x32xf32, #tpu.memory_space<vmem>>, vector<1x32xf32>
      %c0_57 = arith.constant 0 : index
      %c0_58 = arith.constant 0 : index
      %103 = vector.load %arg15[%c0_57, %c0_58] : memref<1x32xf32, #tpu.memory_space<vmem>>, vector<1x32xf32>
      %cst_59 = arith.constant dense<0.000000e+00> : vector<8xf32>
      %104 = vector.multi_reduction <add>, %101, %cst_59 [1] : vector<8x32xf32> to vector<8xf32>
      %105 = vector.shape_cast %104 : vector<8xf32> to vector<8x1xf32>
      %cst_60 = arith.constant 3.200000e+01 : f32
      %106 = vector.broadcast %cst_60 : f32 to vector<8x1xf32>
      %107 = arith.divf %105, %106 : vector<8x1xf32>
      %108 = vector.broadcast %107 : vector<8x1xf32> to vector<8x32xf32>
      %109 = arith.subf %101, %108 : vector<8x32xf32>
      %110 = arith.mulf %109, %109 : vector<8x32xf32>
      %cst_61 = arith.constant dense<0.000000e+00> : vector<8xf32>
      %111 = vector.multi_reduction <add>, %110, %cst_61 [1] : vector<8x32xf32> to vector<8xf32>
      %112 = vector.shape_cast %111 : vector<8xf32> to vector<8x1xf32>
      %cst_62 = arith.constant 3.200000e+01 : f32
      %113 = vector.broadcast %cst_62 : f32 to vector<8x1xf32>
      %114 = arith.divf %112, %113 : vector<8x1xf32>
      %115 = vector.broadcast %107 : vector<8x1xf32> to vector<8x32xf32>
      %116 = arith.subf %101, %115 : vector<8x32xf32>
      %cst_63 = arith.constant 9.99999974E-6 : f32
      %117 = vector.broadcast %cst_63 : f32 to vector<8x1xf32>
      %118 = arith.addf %114, %117 : vector<8x1xf32>
      %119 = math.rsqrt %118 : vector<8x1xf32>
      %120 = vector.broadcast %119 : vector<8x1xf32> to vector<8x32xf32>
      %121 = arith.mulf %116, %120 : vector<8x32xf32>
      %122 = vector.broadcast %102 : vector<1x32xf32> to vector<8x32xf32>
      %123 = arith.mulf %121, %122 : vector<8x32xf32>
      %124 = vector.broadcast %103 : vector<1x32xf32> to vector<8x32xf32>
      %125 = arith.addf %123, %124 : vector<8x32xf32>
      %c0_64 = arith.constant 0 : index
      %c0_65 = arith.constant 0 : index
      %c0_66 = arith.constant 0 : index
      %126 = vector.load %arg16[%c0_64, %c0_65, %c0_66] : memref<1x8x32xf32, #tpu.memory_space<vmem>>, vector<1x8x32xf32>
      %127 = vector.shape_cast %126 : vector<1x8x32xf32> to vector<8x32xf32>
      %128 = vector.shape_cast %125 : vector<8x32xf32> to vector<1x8x32xf32>
      tpu.vector_store %arg16[%c0_64, %c0_65, %c0_66], %128 {strides = array<i32>} : memref<1x8x32xf32, #tpu.memory_space<vmem>>, vector<1x8x32xf32>,
    } else {
    }
    return
  }
  func.func @transform_0(%arg0: i32, %arg1: i32, %arg2: i32) -> (i32, i32, i32) {
    %c0_i32 = arith.constant 0 : i32
    %c0_i32_0 = arith.constant 0 : i32
    return %arg0, %arg1, %c0_i32 : i32, i32, i32
  }
  func.func @transform_1(%arg0: i32, %arg1: i32, %arg2: i32) -> (i32, i32, i32) {
    %0 = arith.minsi %arg2, %arg1 : i32
    %c0_i32 = arith.constant 0 : i32
    %c0_i32_0 = arith.constant 0 : i32
    return %arg0, %0, %c0_i32 : i32, i32, i32
  }
  func.func @transform_2(%arg0: i32, %arg1: i32, %arg2: i32) -> (i32, i32) {
    %c0_i32 = arith.constant 0 : i32
    %c0_i32_0 = arith.constant 0 : i32
    %c0_i32_1 = arith.constant 0 : i32
    return %c0_i32, %c0_i32_0 : i32, i32
  }
  func.func @transform_3(%arg0: i32, %arg1: i32, %arg2: i32) -> (i32, i32) {
    %c0_i32 = arith.constant 0 : i32
    %c0_i32_0 = arith.constant 0 : i32
    %c0_i32_1 = arith.constant 0 : i32
    return %c0_i32, %c0_i32_0 : i32, i32
  }
  func.func @transform_4(%arg0: i32, %arg1: i32, %arg2: i32) -> (i32, i32) {
    %c0_i32 = arith.constant 0 : i32
    %c0_i32_0 = arith.constant 0 : i32
    %c0_i32_1 = arith.constant 0 : i32
    return %c0_i32, %c0_i32_0 : i32, i32
  }
  func.func @transform_5(%arg0: i32, %arg1: i32, %arg2: i32) -> (i32, i32) {
    %c0_i32 = arith.constant 0 : i32
    %c0_i32_0 = arith.constant 0 : i32
    %c0_i32_1 = arith.constant 0 : i32
    return %c0_i32, %c0_i32_0 : i32, i32
  }
  func.func @transform_6(%arg0: i32, %arg1: i32, %arg2: i32) -> (i32, i32) {
    %c0_i32 = arith.constant 0 : i32
    %c0_i32_0 = arith.constant 0 : i32
    %c0_i32_1 = arith.constant 0 : i32
    return %c0_i32, %c0_i32_0 : i32, i32
  }
  func.func @transform_7(%arg0: i32, %arg1: i32, %arg2: i32) -> (i32, i32) {
    %c0_i32 = arith.constant 0 : i32
    %c0_i32_0 = arith.constant 0 : i32
    %c0_i32_1 = arith.constant 0 : i32
    return %c0_i32, %c0_i32_0 : i32, i32
  }
  func.func @transform_8(%arg0: i32, %arg1: i32, %arg2: i32) -> (i32, i32) {
    %c0_i32 = arith.constant 0 : i32
    %c0_i32_0 = arith.constant 0 : i32
    %c0_i32_1 = arith.constant 0 : i32
    return %c0_i32, %c0_i32_0 : i32, i32
  }
  func.func @transform_9(%arg0: i32, %arg1: i32, %arg2: i32) -> (i32, i32) {
    %c0_i32 = arith.constant 0 : i32
    %c0_i32_0 = arith.constant 0 : i32
    %c0_i32_1 = arith.constant 0 : i32
    return %c0_i32, %c0_i32_0 : i32, i32
  }
  func.func @transform_10(%arg0: i32, %arg1: i32, %arg2: i32) -> (i32, i32) {
    %c0_i32 = arith.constant 0 : i32
    %c0_i32_0 = arith.constant 0 : i32
    %c0_i32_1 = arith.constant 0 : i32
    return %c0_i32, %c0_i32_0 : i32, i32
  }
  func.func @transform_11(%arg0: i32, %arg1: i32, %arg2: i32) -> (i32, i32) {
    %c0_i32 = arith.constant 0 : i32
    %c0_i32_0 = arith.constant 0 : i32
    %c0_i32_1 = arith.constant 0 : i32
    return %c0_i32, %c0_i32_0 : i32, i32
  }
  func.func @transform_12(%arg0: i32, %arg1: i32, %arg2: i32) -> (i32, i32) {
    %c0_i32 = arith.constant 0 : i32
    %c0_i32_0 = arith.constant 0 : i32
    %c0_i32_1 = arith.constant 0 : i32
    return %c0_i32, %c0_i32_0 : i32, i32
  }
  func.func @transform_13(%arg0: i32, %arg1: i32, %arg2: i32) -> (i32, i32, i32) {
    %c0_i32 = arith.constant 0 : i32
    %c0_i32_0 = arith.constant 0 : i32
    return %arg0, %arg1, %c0_i32 : i32, i32, i32
  }
}

</mosaic_0001>

<bundles_post_ra>
// kernel: tpu_custom_call.1
= control target key start
LH: loop header
LB: loop body
LE: loop exit
PB: predicated region body
PF: predicated region fallthrough
CT: control target
= control target key end

     0   :  { %18 = vsyncpa [#allocation7], 0  ;;  %s2035_s0 = inlined_call_operand.vmem [shape: f32[2,8,32], index: 0, kind: input, shape index: {}]   ;;  %s2036_s1 = inlined_call_operand.vmem [shape: f32[2,8,32], index: 1, kind: input, shape index: {}]   ;;  %s2037_s2 = inlined_call_operand.vmem [shape: f32[32,128], index: 2, kind: input, shape index: {}]   ;;  %s2038_s3 = inlined_call_operand.vmem [shape: f32[32,256], index: 3, kind: input, shape index: {}]   ;;  %s2039_s4 = inlined_call_operand.vmem [shape: f32[128,32], index: 4, kind: input, shape index: {}]   ;;  %s2040_s5 = inlined_call_operand.vmem [shape: f32[1,32], index: 5, kind: input, shape index: {}]   ;;  %s2041_s6 = inlined_call_operand.vmem [shape: f32[1,32], index: 6, kind: input, shape index: {}]   ;;  %s2042_s7 = inlined_call_operand.vmem [shape: f32[32,128], index: 7, kind: input, shape index: {}]   ;;  %s2043_s8 = inlined_call_operand.vmem [shape: f32[1,128], index: 8, kind: input, shape index: {}]   ;;  %s2044_s9 = inlined_call_operand.vmem [shape: f32[128,32], index: 9, kind: input, shape index: {}]   ;;  %s2045_s10 = inlined_call_operand.vmem [shape: f32[1,32], index: 10, kind: input, shape index: {}]   ;;  %s2046_s11 = inlined_call_operand.vmem [shape: f32[1,32], index: 11, kind: input, shape index: {}]   ;;  %s2047_s12 = inlined_call_operand.vmem [shape: f32[1,32], index: 12, kind: input, shape index: {}]   ;;  %s2048_s13 = inlined_call_operand.hbm [shape: f32[2,8,32], index: 13, kind: output, shape index: {}]  }
   0x1   :  { %20 = vsyncpa [#allocation7 + $0x1], 0  ;;  %s1633_s25 = smov 0   ;;  %s1635_s26 = smov 0  }
   0x2   :  { %s1637_s27 = smov 0   ;;  %s1639_s28 = smov 0  }
   0x3   :  { %s1641_s29 = smov 0   ;;  %s1643_s30 = smov 0  }
   0x4 LB: > { %2053 = sst [smem:[#allocation9_spill]] %s1542_s27  ;;  %s1347_s14 = sadd.s32 4294967295, %s1554_s30   ;;  %s1554_s30 = sphi %s1643_s30, %s26_s30   ;;  %s1550_s29 = sphi %s1641_s29, %s2064_s29   ;;  %s1546_s28 = sphi %s1639_s28, %s2063_s28   ;;  %s1542_s27 = sphi %s1637_s27, %s2062_s27   ;;  %s1538_s26 = sphi %s1635_s26, %s2066_s26   ;;  %s1534_s25 = sphi %s1633_s25, %s2065_s25  }
   0x5   : > { %2054 = sst [smem:[#allocation10_spill]] %s1550_s29  ;;  %s1348_s15 = sadd.s32 4294967294, %s1554_s30  }
   0x6   : > { %s45_s16 = sadd.s32 1, %s1550_s29  ;;  %s345_s17 = sadd.s32 1, %s1542_s27 }
   0x7   : > { %p47_p0 = scmp.ge.s32.totalorder %s45_s16, 2  ;;  %p355_p1 = scmp.ne.s32.totalorder %s1542_s27, %s1538_s26 }
   0x8   : > { %p356_p2 = scmp.eq.s32.totalorder %s1347_s14, 1  ;;  %p361_p3 = scmp.ne.s32.totalorder %s1538_s26, %s1534_s25 }
   0x9   : > { %s2068_s16 = smov (%p47_p0, %s45_s16), 0  ;;  %p362_p5 = scmp.eq.s32.totalorder %s1348_s15, 1 }
   0xa   : > { %2055 = sst [smem:[#allocation11_spill]] %s2068_s16  ;;  %p1673_p4 = por %p356_p2, %p355_p1 }
   0xb   : > { %s340_s19 = ssub.s32 %s1550_s29, %s2068_s16  ;;  %p1351_p6 = scmp.ge.s32.totalorder %s1554_s30, 1 }
   0xc   : > { %p343_p7 = scmp.eq.s32.totalorder %s340_s19, 0  ;;  %p1680_p8 = por %p362_p5, %p361_p3 }
   0xd   : > { %p437_p9 = scmp.lt.s32.totalorder %s1554_s30, 3 }
   0xe   : > { %s2057_s20 = scalar_select %p1680_p8, 1, 0 }
   0xf   : > { %s1686_s21 = scalar_select %p343_p7, %s1542_s27, %s345_s17  }
  0x10   : > { %2058 = sst [smem:[#allocation12_spill]] %s2057_s20  ;;  %p438_p10 = pnand %p1351_p6, %p437_p9 }
  0x11   : > { %2059 = sst [smem:[#allocation13_spill]] %s1686_s21  ;;  %p492_p11 = scmp.lt.s32.totalorder (!%p438_p10), %s1546_s28, 1 }
  0x12   : > { %441 = sbr.rel (%p438_p10) target bundleno = 1901 (0x76d), region = 72  ;;  %s1557_s23 = smov (!%p438_p10), 96  }
  0x13   : > { %s489_s17 = sand.u32 (!%p438_p10), 1, %s1538_s26   ;;  %s1372_s21 = sshll.u32 (!%p438_p10), %s1546_s28, 3 }
  0x14   : > { %s1352_s29 = sshll.u32 (!%p438_p10), %s489_s17, 3  ;;  %s1242_s22 = scalar_lea.sflag (!%p438_p10), [#allocation7], %s489_s17 }
  0x15   : > { %s491_s19 = scalar_lea.vmem (!%p438_p10), [#allocation6], %s1352_s29  ;;  %s1496_s29 = scalar_lea.hbm (!%p438_p10), %s2048_s13, 16 }
  0x17   : > { %v519_v0 = vld [vmem:[%s2037_s2 + $0x10] sm:$0xff]  ;;  %v520_v1 = vld [vmem:[%s2037_s2 + $0x18] sm:$0xff]  ;;  %v517_v2 = vld [vmem:[%s2037_s2] sm:$0xff]  ;;  %s493_s24 = scalar_select %p492_p11, %s1546_s28, 1  ;;  %vm523_vm0 = vcmask 261120   ;;  %v607_v49 = vlaneseq  ;;  %vm639_vm2 = vcmask 64512  }
  0x18   : > { %v522_v3 = vpack.c.bf16 %v520_v1, %v519_v0  ;;  %v518_v4 = vld [vmem:[%s2037_s2 + $0x8] sm:$0xff]  ;;  %v566_v5 = vld [vmem:[%s2038_s3 + $0x20] sm:$0xff]  ;;  %v568_v6 = vld [vmem:[%s2038_s3 + $0x30] sm:$0xff]  ;;  %v1559_v54 = vmov -1e+30   ;;  %vm543_vm3 = vcmask 7168  }
  0x19   : > { %v521_v7 = vpack.c.bf16 %v518_v4, %v517_v2  ;;  %s1353_s14 = sshll.u32 %s493_s24, 3  ;;  %v572_v8 = vpack.c.bf16 %v568_v6, %v566_v5  ;;  %v562_v9 = vld [vmem:[%s2038_s3] sm:$0xff]  ;;  %v564_v10 = vld [vmem:[%s2038_s3 + $0x10] sm:$0xff]  ;;  %s1558_s24 = smov 64   ;;  %v567_v36 = vld [vmem:[%s2038_s3 + $0x28] sm:$0xff]  ;;  %v608_v51 = vshrl.u32 %v607_v49, 7 }
  0x1a   : > { %533 = vmatpush.bf16.msra.mxu1 %v522_v3  ;;  %s498_s27 = scalar_lea.vmem %s2035_s0, %s1353_s14  ;;  %v570_v13 = vpack.c.bf16 %v564_v10, %v562_v9  ;;  %s507_s20 = scalar_lea.vmem %s2036_s1, %s1353_s14  ;;  %v569_v37 = vld [vmem:[%s2038_s3 + $0x38] sm:$0xff]  ;;  %v563_v38 = vld [vmem:[%s2038_s3 + $0x8] sm:$0xff]  ;;  %v613_v52 = vand.u32 127, %v607_v49  ;;  %544 = vst.msk [vmem:[#allocation4] sm:$0xff] %vm543_vm3, %v1559_v54  ;;  %v1560_v60 = vmov 0.0   ;;  %v1561_v61 = vmov 0  }
  0x1b   : > { %v1717_v11 = vld [vmem:[%s498_s27] sm:$0xff]  ;;  %s1556_s27 = smov 32   ;;  %v573_v39 = vpack.c.bf16 %v569_v37, %v567_v36  ;;  %v565_v40 = vld [vmem:[%s2038_s3 + $0x18] sm:$0xff]  ;;  %545 = vst.msk [vmem:[#allocation4 + $0x8] sm:$0xff] %vm543_vm3, %v1559_v54  ;;  %1438 = vset.pattern.permute.xlu2 %v1561_v61  ;;  %1437 = vset.pattern.permute.xlu0 %v1561_v61  ;;  %vm674_vm4 = vcmask 1043456   ;;  %s1255_s28 = sshll.u32 %s491_s19, 4  ;;  %s1256_s28 = int_to_ptr.vmem [resolvable:$true] %s1255_s28 }
  0x1c   : > { %v516_v12 = vpack.c.bf16 %v1717_v11, %v1717_v11  ;;  %v560_v14 = vld [vmem:[%s507_s20] sm:$0xff]  ;;  %v571_v43 = vpack.c.bf16 %v565_v40, %v563_v38  ;;  %vm616_vm1 = vcmp.le.s32.totalorder %v613_v52, %v608_v51  ;;  %546 = vst.msk [vmem:[#allocation4 + $0x10] sm:$0xff] %vm543_vm3, %v1559_v54  ;;  %1439 = vset.pattern.permute.xlu1 %v1561_v61 }
  0x1d   : > { %v561_v15 = vpack.c.bf16 %v560_v14, %v560_v14  ;;  %597 = vmatpush.bf16.msra.mxu2 %v573_v39  ;;  %v617_v55 = vsel %vm616_vm1, 0.0, %v1559_v54  ;;  %547 = vst.msk [vmem:[#allocation4 + $0x18] sm:$0xff] %vm543_vm3, %v1559_v54 }
  0x1e   : > { %534 = vmatpush.bf16.msra.mxu1 %v521_v7  ;;  %548 = vst.msk [vmem:[#allocation5] sm:$0xff] %vm543_vm3, %v1560_v60 }
  0x1f   : > { %549 = vst.msk [vmem:[#allocation5 + $0x8] sm:$0xff] %vm543_vm3, %v1560_v60 }
  0x20   : > { %550 = vst.msk [vmem:[#allocation5 + $0x10] sm:$0xff] %vm543_vm3, %v1560_v60 }
  0x21   : > { %1355 = vmatmul.msk.bf16.vlgmr.msra.gmra.mxu1 %vm523_vm0, %v516_v12  ;;  %598 = vmatpush.bf16.msra.mxu2 %v571_v43  ;;  %551 = vst.msk [vmem:[#allocation5 + $0x18] sm:$0xff] %vm543_vm3, %v1560_v60  ;;  %v1773_v1 = vld [vmem:[#allocation4] sm:$0xff] }
  0x22   : > { %584 = vmatpush.bf16.msrb.mxu1 %v572_v8  ;;  %552 = vst.msk [vmem:[#allocation3] sm:$0xff] %vm523_vm0, %v1560_v60 }
  0x23   : > { %553 = vst.msk [vmem:[#allocation3 + $0x8] sm:$0xff] %vm523_vm0, %v1560_v60 }
  0x24   : > { %1357 = vmatmul.msk.bf16.vlgmr.msra.gmra.mxu2 %vm523_vm0, %v561_v15  ;;  %554 = vst.msk [vmem:[#allocation3 + $0x10] sm:$0xff] %vm523_vm0, %v1560_v60 }
  0x25   : > { %555 = vst.msk [vmem:[#allocation3 + $0x18] sm:$0xff] %vm523_vm0, %v1560_v60 }
  0x26   : > { %585 = vmatpush.bf16.msrb.mxu1 %v570_v13 }
  0x31   : > { %1356 = vmatmul.msk.bf16.vlgmr.msrb.gmra.mxu1 %vm523_vm0, %v561_v15 }
  0x9e   : > { %v536_v16 = vpop.f32.mrf.mxu1 }
  0x9f   : > { %v540_v17 = vmul.f32 0.17677669, %v536_v16 }
  0xa1   : > { %v541_v18 = vpack.c.bf16 %v540_v17, %v540_v17 }
  0xa3   : > { %542 = vst [vmem:[#allocation2] sm:$0xf] %v541_v18 }
  0xa6   : > { %v538_v19 = vpop.f32.mrf.mxu1 }
  0xa7   : > { %v600_v10 = vpop.f32.mrf.mxu2 }
  0xa8   : > { %v605_v12 = vpack.c.bf16 %v600_v10, %v600_v10 }
  0xaa   : > { %v870_v20 = vld [vmem:[#allocation2] sm:$0xf]  ;;  %v759_v14 = vunpack.c.l.b16 %v605_v12 }
  0xab   : > { %v872_v21 = vunpack.c.l.b16 %v870_v20  ;;  %v785_v24 = vld [vmem:[#allocation2] sm:$0xf]  ;;  %v676_v20 = vsel %vm674_vm4, %v605_v12, 0 }
  0xac   : > { %v787_v28 = vunpack.c.l.b16 %v785_v24  ;;  %v694_v30 = vld [vmem:[#allocation2] sm:$0xf]  ;;  %v760_v16 = vpack.c.b16 %v759_v14, %v759_v14  ;;  %685 = vmatpush.bf16.msra.mxu0 %v676_v20 }
  0xad   : > { %v873_v22 = vpack.c.b16 %v872_v21, %v872_v21  ;;  %v696_v33 = vunpack.c.l.b16 %v694_v30  ;;  %v618_v34 = vld [vmem:[#allocation2] sm:$0xf]  ;;  %v1795_v21 = vld [vmem:[#allocation4 + $0x8] sm:$0xff] }
  0xae   : > { %v587_v23 = vpop.f32.mrf.mxu1  ;;  %v788_v31 = vpack.c.b16 %v787_v28, %v787_v28 }
  0xaf   : > { %v604_v25 = vpack.c.bf16 %v587_v23, %v587_v23  ;;  %874 = vrot.lane.b32.xlu2 %v873_v22, %s1556_s27  ;;  %v697_v35 = vpack.c.b16 %v696_v33, %v696_v33  ;;  %v602_v19 = vpop.f32.mrf.mxu2 }
  0xb1   : > { %v701_v26 = vunpack.c.l.b16 %v604_v25  ;;  %v623_v27 = vsel %vm523_vm0, %v604_v25, 0  ;;  %v1805_v25 = vld [vmem:[#allocation4 + $0x10] sm:$0xff] }
  0xb2   : > { %632 = vmatpush.bf16.xpose.msra.mxu3 %v623_v27 }
  0xb3   : > { %v702_v29 = vpack.c.b16 %v701_v26, %v701_v26 }
  0xb5   : > { %876 = vrot.lane.b32.xlu1 %v702_v29, %s1556_s27  ;;  %703 = vrot.lane.b32.xlu0 %v702_v29, %s1557_s23 }
  0xb6   : > { %v589_v32 = vpop.f32.mrf.mxu1 }
  0xb7   : > { %789 = vrot.lane.b32.xlu2 %v788_v31, %s1558_s24 }
  0xb9   : > { %1358 = vmatmul.msk.bf16.vlgmr.msra.gmra.mxu3 %vm523_vm0, %v618_v34 }
  0xbd   : > { %791 = vrot.lane.b32.xlu1 %v702_v29, %s1558_s24  ;;  %698 = vrot.lane.b32.xlu0 %v697_v35, %s1557_s23  ;;  %v898_v29 = vld [vmem:[#allocation4 + $0x18] sm:$0xff] }
 0x109   : > { %v875_v46 = vpop.permute.xlu2 %874 }
 0x111   : > { %v790_v53 = vpop.permute.xlu2 %789 }
 0x127   : > { %v877_v41 = vpop.permute.xlu1 %876  ;;  %v704_v42 = vpop.permute.xlu0 %703 }
 0x128   : > { %v882_v44 = vsel %vm523_vm0, %v877_v41, 0  ;;  %v709_v45 = vsel %vm523_vm0, %v704_v42, 0 }
 0x129   : > { %718 = vmatpush.bf16.xpose.msra.mxu1 %v709_v45 }
 0x12f   : > { %v792_v47 = vpop.permute.xlu1 %791  ;;  %v699_v48 = vpop.permute.xlu0 %698 }
 0x130   : > { %1360 = vmatmul.msk.bf16.vlgmr.msra.gmra.mxu1 %vm523_vm0, %v699_v48  ;;  %v797_v50 = vsel %vm523_vm0, %v792_v47, 0 }
 0x131   : > { %891 = vmatpush.bf16.xpose.msrb.mxu1 %v882_v44  ;;  %806 = vmatpush.bf16.xpose.msrb.mxu3 %v797_v50 }
 0x138   : > { %1362 = vmatmul.msk.bf16.vlgmr.msrb.gmra.mxu3 %vm523_vm0, %v790_v53 }
 0x13c   : > { %v634_v56 = vpop.f32.mrf.mxu3 }
 0x13d   : > { %v1752_v57 = vadd.f32 %v634_v56, %v617_v55 }
 0x13f   : > { %v640_v58 = vsel %vm639_vm2, %v1752_v57, -inf }
 0x140   : > { %1364 = vmatmul.msk.bf16.vlgmr.msrb.gmra.mxu1 %vm523_vm0, %v875_v46  ;;  %641 = vmax.xlane.f32.xlu1 %v640_v58 }
 0x144   : > { %v636_v59 = vpop.f32.mrf.mxu3 }
 0x159   : > { %761 = vrot.lane.b32.xlu1 %v760_v16, %s1557_s23 }
 0x1ad   : > { %v720_v62 = vpop.f32.mrf.mxu1 }
 0x1ae   : > { %v1769_v63 = vadd.f32 %v720_v62, %v617_v55 }
 0x1b0   : > { %v726_v0 = vsel %vm639_vm2, %v1769_v63, -inf }
 0x1b1   : > { %727 = vmax.xlane.f32.xlu0 %v726_v0  ;;  %v655_v0 = vld [vmem:[#allocation5] sm:$0xff] }
 0x1b3   : > { %v642_v2 = vpop.xlane.xlu1 %641 }
 0x1b4   : > { %v1776_v3 = vmax.f32 %v1773_v1, %v642_v2 }
 0x1b5   : > { %v722_v4 = vpop.f32.mrf.mxu1 }
 0x1b6   : > { %v644_v5 = vsub.f32 %v1773_v1, %v1776_v3  ;;  %693 = vst.msk [vmem:[#allocation4] sm:$0xff] %vm543_vm3, %v1776_v3 }
 0x1b8   : > { %v645_v56 = vmul.f32 1.442695, %v644_v5 }
 0x1bb   : > { %v808_v6 = vpop.f32.mrf.mxu3 }
 0x1bc   : > { %v1782_v7 = vadd.f32 %v808_v6, %v617_v55 }
 0x1bd   : > { %v893_v8 = vpop.f32.mrf.mxu1 }
 0x1be   : > { %v814_v9 = vsel %vm639_vm2, %v1782_v7, -inf  ;;  %v1786_v13 = vadd.f32 %v893_v8, %v617_v55 }
 0x1bf   : > { %815 = vmax.xlane.f32.xlu2 %v814_v9 }
 0x1c0   : > { %v899_v18 = vsel %vm639_vm2, %v1786_v13, -inf }
 0x1c3   : > { %v810_v15 = vpop.f32.mrf.mxu3 }
 0x1c5   : > { %v895_v17 = vpop.f32.mrf.mxu1 }
 0x1c7   : > { %900 = vmax.xlane.f32.xlu2 %v899_v18 }
 0x1cb   : > { %v762_v35 = vpop.permute.xlu1 %761 }
 0x1cc   : > { %v767_v36 = vsel %vm674_vm4, %v762_v35, 0  ;;  %v971_v35 = vld [vmem:[%s2039_s4 + $0x8] sm:$0xff] }
 0x1cd   : > { %776 = vmatpush.bf16.msrb.mxu2 %v767_v36 }
 0x1df   : > { %649 = vperm.xlu2 %1438, %v1776_v3  }
 0x1e7   : > { %931 = vrot.lane.b32.xlu2 %v760_v16, %s1556_s27 }
 0x1ef   : > { %846 = vrot.lane.b32.xlu2 %v760_v16, %s1558_s24  ;;  %v742_v16 = vld [vmem:[#allocation5 + $0x8] sm:$0xff]  ;;  %s1253_s24 = scalar_lea.hbm %s2048_s13, %s1372_s21 }
 0x1f0   : > { %s1257_s16 = sshll.u32 %s1253_s24, 4  ;;  %s1258_s16 = int_to_ptr.hbm [resolvable:$true] %s1257_s16 }
 0x1f1   : > { %s1490_s20 = sshra.s32 %s1258_s16, 4  ;;  %s1491_s20 = int_to_ptr.hbm [resolvable:$true] %s1490_s20 }
 0x1f2   : > { %s1492_s21 = scalar_lea.hbm %s1491_s20, 8  ;;  %p1497_p1 = scmp.lt.s32.totalorder %s1491_s20, %s2048_s13 }
 0x1f3   : > { %p1493_p12 = scmp.ne.s32.totalorder %s1491_s20, %s1492_s21  ;;  %p1498_p2 = scmp.lt.s32.totalorder %s1496_s29, %s1492_s21 }
 0x1f5   : > { %p1494_p13 = pnand %p1493_p12, %p1673_p4  ;;  %p1499_p3 = por %p1498_p2, %p1497_p1 }
 0x1f7   : > { %p1495_p0 = pneg %p1494_p13 }
 0x1f9   : > { %p1500_p5 = pnand %p1499_p3, %p1495_p0 }
 0x224   : > { %v728_v22 = vpop.xlane.xlu0 %727 }
 0x225   : > { %v1798_v23 = vmax.f32 %v1795_v21, %v728_v22 }
 0x227   : > { %v730_v24 = vsub.f32 %v1795_v21, %v1798_v23  ;;  %784 = vst.msk [vmem:[#allocation4 + $0x8] sm:$0xff] %vm543_vm3, %v1798_v23  ;;  %735 = vperm.xlu0 %1437, %v1798_v23   ;;  %v915_v23 = vld [vmem:[#allocation5 + $0x18] sm:$0xff] }
 0x232   : > { %v816_v26 = vpop.xlane.xlu2 %815 }
 0x233   : > { %v1808_v27 = vmax.f32 %v1805_v25, %v816_v26 }
 0x235   : > { %v818_v28 = vsub.f32 %v1805_v25, %v1808_v27  ;;  %869 = vst.msk [vmem:[#allocation4 + $0x10] sm:$0xff] %vm543_vm3, %v1808_v27 }
 0x237   : > { %v819_v9 = vmul.f32 1.442695, %v818_v28  ;;  %v830_v28 = vld [vmem:[#allocation5 + $0x10] sm:$0xff] }
 0x23a   : > { %v901_v30 = vpop.xlane.xlu2 %900 }
 0x23b   : > { %v902_v31 = vmax.f32 %v898_v29, %v901_v30  ;;  %v973_v30 = vld [vmem:[%s2039_s4 + $0x18] sm:$0xff] }
 0x23d   : > { %954 = vst.msk [vmem:[#allocation4 + $0x18] sm:$0xff] %vm543_vm3, %v902_v31  ;;  %908 = vperm.xlu1 %1439, %v902_v31   ;;  %v903_v42 = vsub.f32 %v898_v29, %v902_v31  ;;  %v972_v29 = vld [vmem:[%s2039_s4 + $0x10] sm:$0xff] }
 0x23e   : > { %v975_v31 = vpack.c.bf16 %v973_v30, %v972_v29 }
 0x23f   : > { %v904_v43 = vmul.f32 1.442695, %v903_v42  ;;  %v1077_v42 = vld [vmem:[%s2039_s4 + $0x78] sm:$0xff] }
 0x242   : > { %v650_v32 = vpop.permute.xlu2 %649 }
 0x243   : > { %v652_v33 = vsub.f32 %v1752_v57, %v650_v32 }
 0x245   : > { %v653_v34 = vmul.f32 1.442695, %v652_v33  ;;  %823 = vperm.xlu1 %1439, %v1808_v27  }
 0x247   : > { %1446 = vpow2.f32 %v653_v34  ;;  %v970_v34 = vld [vmem:[%s2039_s4] sm:$0xff] }
 0x248   : > { %1448 = vpow2.f32 %v904_v43  ;;  %v990_v43 = vld [vmem:[%s2039_s4 + $0x30] sm:$0xff] }
 0x24a   : > { %v932_v37 = vpop.permute.xlu2 %931 }
 0x24b   : > { %v937_v38 = vsel %vm674_vm4, %v932_v37, 0  ;;  %v974_v37 = vpack.c.bf16 %v971_v35, %v970_v34 }
 0x24c   : > { %946 = vmatpush.bf16.msra.mxu2 %v937_v38 }
 0x24d   : > { %v1447_v39 = vpop.eup %1446 }
 0x24e   : > { %v657_v40 = vsel %vm639_vm2, %v1447_v39, 0.0  ;;  %v670_v41 = vpack.c.bf16 %v1447_v39, %v1447_v39  ;;  %v1821_v44 = vpop.eup %1448  ;;  %v923_v39 = vld [vmem:[#allocation3 + $0x18] sm:$0xff] }
 0x24f   : > { %658 = vadd.xlane.f32.xlu2 %v657_v40 }
 0x250   : > { %1359 = vmatmul.msk.bf16.vlgmr.msra.gmra.mxu0 %vm639_vm2, %v670_v41  ;;  %v1076_v41 = vld [vmem:[%s2039_s4 + $0x70] sm:$0xff] }
 0x252   : > { %v847_v45 = vpop.permute.xlu2 %846 }
 0x253   : > { %v852_v46 = vsel %vm674_vm4, %v847_v45, 0  ;;  %v991_v45 = vld [vmem:[%s2039_s4 + $0x38] sm:$0xff] }
 0x254   : > { %861 = vmatpush.bf16.msrb.mxu0 %v852_v46  ;;  %v993_v46 = vpack.c.bf16 %v991_v45, %v990_v43 }
 0x256   : > { %1004 = vmatpush.bf16.msra.mxu3 %v993_v46  ;;  %v1562_v46 = vmov 32.0  }
 0x258   : > { %1020 = vmatpush.bf16.msra.mxu0 %v975_v31 }
 0x25c   : > { %1021 = vmatpush.bf16.msra.mxu0 %v974_v37 }
 0x267   : > { %926 = vperm.xlu2 %1438, %v1821_v44  }
 0x299   : > { %v736_v47 = vpop.permute.xlu0 %735 }
 0x29a   : > { %v738_v48 = vsub.f32 %v1769_v63, %v736_v47 }
 0x29c   : > { %v739_v49 = vmul.f32 1.442695, %v738_v48 }
 0x29e   : > { %1450 = vpow2.f32 %v739_v49 }
 0x2a4   : > { %v1451_v50 = vpop.eup %1450 }
 0x2a5   : > { %v744_v51 = vsel %vm639_vm2, %v1451_v50, 0.0  ;;  %v757_v52 = vpack.c.bf16 %v1451_v50, %v1451_v50 }
 0x2a6   : > { %745 = vadd.xlane.f32.xlu0 %v744_v51 }
 0x2a7   : > { %1361 = vmatmul.msk.bf16.vlgmr.msrb.gmra.mxu2 %vm639_vm2, %v757_v52 }
 0x2af   : > { %v909_v53 = vpop.permute.xlu1 %908 }
 0x2b0   : > { %v911_v54 = vsub.f32 %v1786_v13, %v909_v53  ;;  %v750_v53 = vld [vmem:[#allocation3 + $0x8] sm:$0xff] }
 0x2b2   : > { %v912_v55 = vmul.f32 1.442695, %v911_v54 }
 0x2b4   : > { %1452 = vpow2.f32 %v912_v55 }
 0x2b5   : > { %1454 = vpow2.f32 %v645_v56 }
 0x2b7   : > { %v824_v57 = vpop.permute.xlu1 %823 }
 0x2b8   : > { %v826_v58 = vsub.f32 %v1782_v7, %v824_v57  ;;  %v731_v7 = vmul.f32 1.442695, %v730_v24  ;;  %v916_v24 = vmul.f32 %v1821_v44, %v915_v23  ;;  %v1079_v44 = vpack.c.bf16 %v1077_v42, %v1076_v41 }
 0x2ba   : > { %v1453_v59 = vpop.eup %1452  ;;  %v827_v60 = vmul.f32 1.442695, %v826_v58  ;;  %1089 = vmatpush.bf16.msrb.mxu2 %v1079_v44  ;;  %v663_v58 = vld [vmem:[#allocation3] sm:$0xff] }
 0x2bb   : > { %v930_v61 = vpack.c.bf16 %v1453_v59, %v1453_v59  ;;  %v917_v62 = vsel %vm639_vm2, %v1453_v59, 0.0  ;;  %v1455_v63 = vpop.eup %1454 }
 0x2bc   : > { %1456 = vpow2.f32 %v827_v60  ;;  %918 = vadd.xlane.f32.xlu1 %v917_v62  ;;  %v656_v2 = vmul.f32 %v1455_v63, %v655_v0  ;;  %v838_v0 = vld [vmem:[#allocation3 + $0x10] sm:$0xff] }
 0x2bd   : > { %1365 = vmatmul.msk.bf16.vlgmr.msra.gmra.mxu2 %vm639_vm2, %v930_v61  ;;  %1458 = vpow2.f32 %v731_v7 }
 0x2be   : > { %1460 = vpow2.f32 %v819_v9  ;;  %v1074_v9 = vld [vmem:[%s2039_s4 + $0x60] sm:$0xff] }
 0x2c2   : > { %v1457_v4 = vpop.eup %1456  ;;  %v659_v1 = vpop.xlane.xlu2 %658 }
 0x2c3   : > { %v660_v3 = vadd.f32 %v659_v1, %v656_v2  ;;  %v832_v5 = vsel %vm639_vm2, %v1457_v4, 0.0  ;;  %v845_v6 = vpack.c.bf16 %v1457_v4, %v1457_v4  ;;  %v1459_v10 = vpop.eup %1458 }
 0x2c4   : > { %833 = vadd.xlane.f32.xlu0 %v832_v5  ;;  %v1461_v14 = vpop.eup %1460  ;;  %v743_v17 = vmul.f32 %v1459_v10, %v742_v16  ;;  %v1042_v16 = vld [vmem:[%s2039_s4 + $0x58] sm:$0xff] }
 0x2c5   : > { %662 = vst.msk [vmem:[#allocation5] sm:$0xff] %vm543_vm3, %v660_v3  ;;  %1363 = vmatmul.msk.bf16.vlgmr.msrb.gmra.mxu0 %vm639_vm2, %v845_v6  ;;  %v831_v32 = vmul.f32 %v1461_v14, %v830_v28 }
 0x2ca   : > { %v927_v40 = vpop.permute.xlu2 %926 }
 0x2cb   : > { %v929_v47 = vmul.f32 %v927_v40, %v923_v39 }
 0x2cc   : > { %v960_v13 = vld [vmem:[#allocation5] sm:$0xff] }
 0x2cd   : > { %v1841_v8 = vpop.f32.mrf.mxu0  ;;  %1462 = vrcp.f32 %v960_v13  ;;  %v989_v13 = vld [vmem:[%s2039_s4 + $0x28] sm:$0xff] }
 0x2d3   : > { %v1463_v15 = vpop.eup %1462 }
 0x2d5   : > { %v689_v12 = vpop.f32.mrf.mxu0  ;;  %753 = vperm.xlu1 %1439, %v1459_v10  }
 0x2d6   : > { %v988_v12 = vld [vmem:[%s2039_s4 + $0x20] sm:$0xff] }
 0x2d8   : > { %666 = vperm.xlu0 %1437, %v1455_v63  }
 0x2dd   : > { %841 = vperm.xlu1 %1439, %v1461_v14   ;;  %v992_v14 = vpack.c.bf16 %v989_v13, %v988_v12  ;;  %v1174_v12 = vld [vmem:[%s2044_s9 + $0x40] sm:$0xff]  ;;  %v1175_v13 = vld [vmem:[%s2044_s9 + $0x48] sm:$0xff] }
 0x2df   : > { %1005 = vmatpush.bf16.msra.mxu3 %v992_v14  ;;  %v1186_v14 = vpack.c.bf16 %v1175_v13, %v1174_v12 }
 0x2e5   : > { %965 = vperm.xlu1 %1439, %v1463_v15   ;;  %v1041_v15 = vld [vmem:[%s2039_s4 + $0x50] sm:$0xff] }
 0x319   : > { %v746_v18 = vpop.xlane.xlu0 %745 }
 0x31a   : > { %v747_v19 = vadd.f32 %v746_v18, %v743_v17  ;;  %v1044_v17 = vpack.c.bf16 %v1042_v16, %v1041_v15  ;;  %v1172_v16 = vld [vmem:[%s2044_s9 + $0x30] sm:$0xff] }
 0x31c   : > { %748 = vst.msk [vmem:[#allocation5 + $0x8] sm:$0xff] %vm543_vm3, %v747_v19  ;;  %1054 = vmatpush.bf16.msra.mxu1 %v1044_v17  ;;  %v1173_v17 = vld [vmem:[%s2044_s9 + $0x38] sm:$0xff] }
 0x323   : > { %v977_v20 = vld [vmem:[#allocation5 + $0x8] sm:$0xff] }
 0x324   : > { %1464 = vrcp.f32 %v977_v20  ;;  %v1039_v20 = vld [vmem:[%s2039_s4 + $0x40] sm:$0xff] }
 0x32a   : > { %v1465_v21 = vpop.eup %1464  ;;  %v778_v22 = vpop.f32.mrf.mxu2 }
 0x32b   : > { %983 = vperm.xlu0 %1437, %v1465_v21   ;;  %v1040_v21 = vld [vmem:[%s2039_s4 + $0x48] sm:$0xff] }
 0x32c   : > { %v1043_v23 = vpack.c.bf16 %v1040_v21, %v1039_v20  ;;  %v1185_v20 = vpack.c.bf16 %v1173_v17, %v1172_v16  ;;  %v1170_v21 = vld [vmem:[%s2044_s9 + $0x20] sm:$0xff] }
 0x32e   : > { %1055 = vmatpush.bf16.msra.mxu1 %v1043_v23 }
 0x32f   : > { %v919_v25 = vpop.xlane.xlu1 %918 }
 0x330   : > { %v920_v26 = vadd.f32 %v919_v25, %v916_v24 }
 0x332   : > { %921 = vst.msk [vmem:[#allocation5 + $0x18] sm:$0xff] %vm543_vm3, %v920_v26  ;;  %v780_v27 = vpop.f32.mrf.mxu2 }
 0x337   : > { %v834_v33 = vpop.xlane.xlu0 %833 }
 0x338   : > { %v835_v36 = vadd.f32 %v834_v33, %v831_v32 }
 0x339   : > { %v1063_v38 = vld [vmem:[#allocation5 + $0x18] sm:$0xff] }
 0x33a   : > { %836 = vst.msk [vmem:[#allocation5 + $0x10] sm:$0xff] %vm543_vm3, %v835_v36  ;;  %1466 = vrcp.f32 %v1063_v38 }
 0x340   : > { %v1467_v48 = vpop.eup %1466  ;;  %v948_v49 = vpop.f32.mrf.mxu2 }
 0x341   : > { %v952_v50 = vadd.f32 %v948_v49, %v929_v47  ;;  %1069 = vperm.xlu2 %1438, %v1467_v48   ;;  %v1028_v51 = vld [vmem:[#allocation5 + $0x10] sm:$0xff] }
 0x342   : > { %v863_v52 = vpop.f32.mrf.mxu0  ;;  %1468 = vrcp.f32 %v1028_v51 }
 0x343   : > { %953 = vst.msk [vmem:[#allocation3 + $0x18] sm:$0xff] %vm523_vm0, %v952_v50  ;;  %1470 = vrcp.f32 %v1562_v46  ;;  %v1443_v46 = vld [vmem:[%s2045_s10] ss:$0 sm:$0xff] }
 0x347   : > { %v754_v54 = vpop.permute.xlu1 %753 }
 0x348   : > { %v1469_v55 = vpop.eup %1468  ;;  %v756_v56 = vmul.f32 %v754_v54, %v750_v53  ;;  %v950_v57 = vpop.f32.mrf.mxu2 }
 0x349   : > { %1034 = vperm.xlu0 %1437, %v1469_v55   ;;  %v1471_v47 = vpop.eup %1470  ;;  %v1140_v57 = vld [vmem:[%s2042_s7 + $0x10] sm:$0xff] }
 0x34a   : > { %v782_v59 = vadd.f32 %v778_v22, %v756_v56  ;;  %v865_v60 = vpop.f32.mrf.mxu0  ;;  %v667_v61 = vpop.permute.xlu0 %666  ;;  %v1066_v19 = vld [vmem:[#allocation3 + $0x18] sm:$0xff]  ;;  %v1104_v48 = vmul.f32 32.0, %v1471_v47  ;;  %vm1108_vm5 = vweird.f32 %v1471_v47 }
 0x34b   : > { %v669_v62 = vmul.f32 %v667_v61, %v663_v58  ;;  %v1141_v58 = vld [vmem:[%s2042_s7 + $0x18] sm:$0xff]  ;;  %v1138_v60 = vld [vmem:[%s2042_s7] sm:$0xff]  ;;  %v1139_v61 = vld [vmem:[%s2042_s7 + $0x8] sm:$0xff] }
 0x34c   : > { %783 = vst.msk [vmem:[#allocation3 + $0x8] sm:$0xff] %vm523_vm0, %v782_v59  ;;  %v1105_v49 = vsub.f32 1.0, %v1104_v48  ;;  %v1143_v59 = vpack.c.bf16 %v1141_v58, %v1140_v57 }
 0x34d   : > { %v691_v63 = vadd.f32 %v1841_v8, %v669_v62  ;;  %v1075_v8 = vld [vmem:[%s2039_s4 + $0x68] sm:$0xff]  ;;  %v1142_v62 = vpack.c.bf16 %v1139_v61, %v1138_v60 }
 0x34e   : > { %v1078_v10 = vpack.c.bf16 %v1075_v8, %v1074_v9  ;;  %v1106_v50 = vmul.f32 %v1471_v47, %v1105_v49  ;;  %1157 = vmatpush.bf16.msrb.mxu3 %v1143_v59  ;;  %v1176_v9 = vld [vmem:[%s2044_s9 + $0x50] sm:$0xff]  ;;  %v1177_v8 = vld [vmem:[%s2044_s9 + $0x58] sm:$0xff] }
 0x34f   : > { %692 = vst.msk [vmem:[#allocation3] sm:$0xff] %vm523_vm0, %v691_v63  ;;  %v842_v2 = vpop.permute.xlu1 %841  ;;  %v1180_v63 = vld [vmem:[%s2044_s9 + $0x70] sm:$0xff] }
 0x350   : > { %v844_v4 = vmul.f32 %v842_v2, %v838_v0  ;;  %1090 = vmatpush.bf16.msrb.mxu2 %v1078_v10  ;;  %v1107_v51 = vadd.f32 %v1471_v47, %v1106_v50  ;;  %v1181_v0 = vld [vmem:[%s2044_s9 + $0x78] sm:$0xff]  ;;  %v1178_v2 = vld [vmem:[%s2044_s9 + $0x60] sm:$0xff]  ;;  %v1187_v10 = vpack.c.bf16 %v1177_v8, %v1176_v9 }
 0x352   : > { %v867_v1 = vadd.f32 %v863_v52, %v844_v4  ;;  %v1909_v52 = vsel %vm1108_vm5, %v1471_v47, %v1107_v51  ;;  %1158 = vmatpush.bf16.msrb.mxu3 %v1142_v62 }
 0x353   : > { %v980_v24 = vld [vmem:[#allocation3 + $0x8] sm:$0xff] }
 0x354   : > { %868 = vst.msk [vmem:[#allocation3 + $0x10] sm:$0xff] %vm523_vm0, %v867_v1  ;;  %v1189_v1 = vpack.c.bf16 %v1181_v0, %v1180_v63 }
 0x356   : > { %v962_v3 = vld [vmem:[#allocation3] sm:$0xff]  ;;  %1194 = vmatpush.bf16.msrb.mxu0 %v1189_v1 }
 0x357   : > { %v966_v5 = vpop.permute.xlu1 %965 }
 0x358   : > { %v968_v6 = vmul.f32 %v966_v5, %v962_v3  ;;  %v1179_v3 = vld [vmem:[%s2044_s9 + $0x68] sm:$0xff] }
 0x35a   : > { %v969_v7 = vpack.c.bf16 %v968_v6, %v968_v6  ;;  %v1188_v6 = vpack.c.bf16 %v1179_v3, %v1178_v2  ;;  %v1445_v3 = vld [vmem:[%s2047_s12] ss:$0 sm:$0xff] }
 0x35b   : > { %v1031_v29 = vld [vmem:[#allocation3 + $0x10] sm:$0xff] }
 0x35c   : > { %1367 = vmatmul.msk.bf16.vlgmr.msra.gmra.mxu0 %vm523_vm0, %v969_v7 }
 0x35d   : > { %1195 = vmatpush.bf16.msrb.mxu0 %v1188_v6 }
 0x361   : > { %1196 = vmatpush.bf16.msrb.mxu0 %v1187_v10 }
 0x365   : > { %1197 = vmatpush.bf16.msrb.mxu0 %v1186_v14 }
 0x369   : > { %1198 = vmatpush.bf16.msrb.mxu0 %v1185_v20 }
 0x39b   : > { %v1070_v18 = vpop.permute.xlu2 %1069 }
 0x39c   : > { %v1072_v22 = vmul.f32 %v1070_v18, %v1066_v19 }
 0x39d   : > { %v984_v25 = vpop.permute.xlu0 %983 }
 0x39e   : > { %v1073_v26 = vpack.c.bf16 %v1072_v22, %v1072_v22  ;;  %v986_v27 = vmul.f32 %v984_v25, %v980_v24  ;;  %v1171_v22 = vld [vmem:[%s2044_s9 + $0x28] sm:$0xff] }
 0x39f   : > { %v1184_v25 = vpack.c.bf16 %v1171_v22, %v1170_v21 }
 0x3a0   : > { %v987_v28 = vpack.c.bf16 %v986_v27, %v986_v27  ;;  %1369 = vmatmul.msk.bf16.vlgmr.msrb.gmra.mxu2 %vm523_vm0, %v1073_v26  ;;  %v1440_v27 = vld [vmem:[%s2040_s5] ss:$0 sm:$0xff] }
 0x3a1   : > { %1199 = vmatpush.bf16.msrb.mxu0 %v1184_v25 }
 0x3a2   : > { %1366 = vmatmul.msk.bf16.vlgmr.msra.gmra.mxu3 %vm523_vm0, %v987_v28 }
 0x3bb   : > { %v1035_v30 = vpop.permute.xlu0 %1034 }
 0x3bc   : > { %v1037_v31 = vmul.f32 %v1035_v30, %v1031_v29  ;;  %v1441_v29 = vld [vmem:[%s2041_s6] ss:$0 sm:$0xff] }
 0x3be   : > { %v1038_v32 = vpack.c.bf16 %v1037_v31, %v1037_v31 }
 0x3c0   : > { %1368 = vmatmul.msk.bf16.vlgmr.msra.gmra.mxu1 %vm523_vm0, %v1038_v32 }
 0x3d9   : > { %v1023_v33 = vpop.f32.mrf.mxu0 }
 0x3e1   : > { %v1025_v34 = vpop.f32.mrf.mxu0 }
 0x3e2   : > { %v1168_v34 = vld [vmem:[%s2044_s9 + $0x10] sm:$0xff] }
 0x423   : > { %v1092_v35 = vpop.f32.mrf.mxu2 }
 0x425   : > { %v1007_v36 = vpop.f32.mrf.mxu3 }
 0x426   : > { %v1024_v39 = vadd.f32 %v1023_v33, %v1007_v36 }
 0x42b   : > { %v1094_v37 = vpop.f32.mrf.mxu2 }
 0x42c   : > { %v1166_v37 = vld [vmem:[%s2044_s9] sm:$0xff] }
 0x42d   : > { %v1009_v38 = vpop.f32.mrf.mxu3 }
 0x42e   : > { %v1167_v38 = vld [vmem:[%s2044_s9 + $0x8] sm:$0xff] }
 0x43d   : > { %v1057_v40 = vpop.f32.mrf.mxu1 }
 0x43e   : > { %v1061_v41 = vadd.f32 %v1057_v40, %v1024_v39  ;;  %v1182_v39 = vpack.c.bf16 %v1167_v38, %v1166_v37  ;;  %v1442_v40 = vld [vmem:[%s2043_s8] ss:$0 sm:$0xff] }
 0x440   : > { %v1096_v42 = vadd.f32 %v1092_v35, %v1061_v41  ;;  %v1169_v35 = vld [vmem:[%s2044_s9 + $0x18] sm:$0xff] }
 0x441   : > { %v1183_v36 = vpack.c.bf16 %v1169_v35, %v1168_v34 }
 0x442   : > { %v1097_v43 = vadd.f32 %v1096_v42, %v1717_v11 }
 0x443   : > { %1200 = vmatpush.bf16.msrb.mxu0 %v1183_v36 }
 0x444   : > { %v1100_v44 = vsel %vm523_vm0, %v1097_v43, 0.0 }
 0x445   : > { %1101 = vadd.xlane.f32.xlu2 %v1100_v44  ;;  %v1059_v45 = vpop.f32.mrf.mxu1 }
 0x447   : > { %1201 = vmatpush.bf16.msrb.mxu0 %v1182_v39 }
 0x4b8   : > { %v1102_v53 = vpop.xlane.xlu2 %1101 }
 0x4b9   : > { %v1110_v54 = vmul.f32 %v1909_v52, %v1102_v53 }
 0x4bb   : > { %v1111_v55 = vsub.f32 %v1097_v43, %v1110_v54 }
 0x4bd   : > { %v1112_v56 = vmul.f32 %v1111_v55, %v1111_v55 }
 0x4bf   : > { %v1113_v11 = vsel %vm523_vm0, %v1112_v56, 0.0 }
 0x4c0   : > { %1114 = vadd.xlane.f32.xlu1 %v1113_v11 }
 0x533   : > { %v1115_v4 = vpop.xlane.xlu1 %1114 }
 0x534   : > { %v1116_v5 = vmul.f32 %v1115_v4, %v1909_v52  ;;  %v1444_v4 = vld [vmem:[%s2046_s11] ss:$0 sm:$0xff] }
 0x536   : > { %v1117_v7 = vadd.f32 1e-05, %v1116_v5 }
 0x538   : > { %1472 = vrsqrt.f32 %v1117_v7  ;;  %vm1124_vm7 = vweird.f32 %v1117_v7 }
 0x53e   : > { %v1473_v15 = vpop.eup %1472 }
 0x53f   : > { %v1119_v18 = vmul.f32 %v1473_v15, %v1117_v7  ;;  %vm1125_vm6 = vweird.f32 %v1473_v15 }
 0x540   : > { %vm1126_vm8 = vmor %vm1124_vm7, %vm1125_vm6 }
 0x541   : > { %v1120_v19 = vmul.f32 %v1473_v15, %v1119_v18 }
 0x543   : > { %v1121_v23 = vmul.f32 0.5, %v1120_v19 }
 0x545   : > { %v1122_v24 = vsub.f32 1.5, %v1121_v23 }
 0x547   : > { %v1123_v26 = vmul.f32 %v1473_v15, %v1122_v24 }
 0x549   : > { %v1127_v28 = vsel %vm1126_vm8, %v1473_v15, %v1123_v26 }
 0x54a   : > { %v1128_v30 = vmul.f32 %v1127_v28, %v1111_v55 }
 0x54c   : > { %v1132_v31 = vmul.f32 %v1440_v27, %v1128_v30 }
 0x54e   : > { %v1136_v32 = vadd.f32 %v1441_v29, %v1132_v31 }
 0x550   : > { %v1137_v33 = vpack.c.bf16 %v1136_v32, %v1136_v32 }
 0x552   : > { %1370 = vmatmul.msk.bf16.vlgmr.msrb.gmra.mxu3 %vm523_vm0, %v1137_v33 }
 0x5d5   : > { %v1160_v41 = vpop.f32.mrf.mxu3 }
 0x5d6   : > { %v1161_v42 = vadd.f32 %v1442_v40, %v1160_v41 }
 0x5d8   : > { %v1164_v43 = vmax.f32 %v1161_v42, 0.0 }
 0x5da   : > { %v1165_v44 = vpack.c.bf16 %v1164_v43, %v1164_v43 }
 0x5dc   : > { %1202 = vmatmul.bf16.vlgmr.msrb.gmra.mxu0 %v1165_v44 }
 0x5dd   : > { %v1162_v45 = vpop.f32.mrf.mxu3 }
 0x659   : > { %v1203_v47 = vpop.f32.mrf.mxu0 }
 0x65a   : > { %v1204_v48 = vadd.f32 %v1443_v46, %v1203_v47 }
 0x65c   : > { %v1207_v49 = vadd.f32 %v1204_v48, %v1136_v32 }
 0x65e   : > { %v1210_v50 = vsel %vm523_vm0, %v1207_v49, 0.0 }
 0x65f   : > { %1211 = vadd.xlane.f32.xlu0 %v1210_v50 }
 0x661   : > { %v1205_v51 = vpop.f32.mrf.mxu0 }
 0x6d2   : > { %v1212_v53 = vpop.xlane.xlu0 %1211 }
 0x6d3   : > { %v1213_v54 = vmul.f32 %v1212_v53, %v1909_v52 }
 0x6d5   : > { %v1214_v55 = vsub.f32 %v1207_v49, %v1213_v54 }
 0x6d7   : > { %v1215_v56 = vmul.f32 %v1214_v55, %v1214_v55 }
 0x6d9   : > { %v1216_v11 = vsel %vm523_vm0, %v1215_v56, 0.0 }
 0x6da   : > { %1217 = vadd.xlane.f32.xlu2 %v1216_v11 }
 0x74d   : > { %v1218_v57 = vpop.xlane.xlu2 %1217 }
 0x74e   : > { %v1219_v58 = vmul.f32 %v1218_v57, %v1909_v52 }
 0x750   : > { %v1220_v59 = vadd.f32 1e-05, %v1219_v58 }
 0x752   : > { %1474 = vrsqrt.f32 %v1220_v59  ;;  %vm1227_vm10 = vweird.f32 %v1220_v59 }
 0x758   : > { %v1475_v60 = vpop.eup %1474 }
 0x759   : > { %v1222_v61 = vmul.f32 %v1475_v60, %v1220_v59  ;;  %vm1228_vm9 = vweird.f32 %v1475_v60 }
 0x75a   : > { %vm1229_vm11 = vmor %vm1227_vm10, %vm1228_vm9 }
 0x75b   : > { %v1223_v62 = vmul.f32 %v1475_v60, %v1222_v61 }
 0x75d   : > { %v1224_v63 = vmul.f32 0.5, %v1223_v62 }
 0x75f   : > { %v1225_v0 = vsub.f32 1.5, %v1224_v63 }
 0x761   : > { %v1226_v2 = vmul.f32 %v1475_v60, %v1225_v0 }
 0x763   : > { %v1230_v52 = vsel %vm1229_vm11, %v1475_v60, %v1226_v2 }
 0x764   : > { %v1231_v1 = vmul.f32 %v1230_v52, %v1214_v55 }
 0x766   : > { %v1235_v5 = vmul.f32 %v1444_v4, %v1231_v1 }
 0x768   : > { %v1239_v6 = vadd.f32 %v1445_v3, %v1235_v5 }
 0x76a   : > { %1240 = vst.msk [vmem:[%s491_s19] sm:$0xff] %vm523_vm0, %v1239_v6 }
 0x76b   : > { %1503 = shalt.err (!%p1500_p5)
}
 0x76c   : > { %1375 = dma.vmem_to_hbm [thread:$0]  (%p1673_p4), %s1256_s28, 128, %s1258_s16, %s1242_s22  }
 0x76d PF: > { %p1381_p6 = scmp.ge.s32.totalorder %s1554_s30, 2  ;;  %s1269_s15 = sand.u32 1, %s1534_s25  }
 0x76e   : > { %s1270_s19 = scalar_lea.sflag [#allocation7], %s1269_s15 }
 0x76f   : > { %p1378_p7 = pnand %p1381_p6, %p1680_p8 }
 0x771   : > { %p1379_p9 = pneg %p1378_p7 }
 0x773   : > { %1529 = dma.done.wait (%p1379_p9), %s1270_s19, 128  }
 0x774   : > { %1531 = vsyncadd (%p1379_p9), %s1270_s19, 4294967168  ;;  %s26_s30 = sadd.s32 1, %s1554_s30   ;;  %s2061_s20 = sld [smem:[#allocation9_spill]] }
 0x775   : > { %p23_p10 = scmp.ge.s32.totalorder %s26_s30, 4   ;;  %s2062_s27 = sld [smem:[#allocation13_spill]] }
 0x776   : > { %s2063_s28 = sld [smem:[#allocation10_spill]]  ;;  %s2065_s25 = smov %s1538_s26 }
 0x777   : > { %s2064_s29 = sld [smem:[#allocation11_spill]]  ;;  %25 = sbr.rel (!%p23_p10) target bundleno = 4 (0x4), region = 137 }
 0x77a   : > { %s2066_s26 = smov %s2061_s20 }
 0x77c   :  { %1276 = vsyncpa [#allocation7], 1 }
 0x77d   :  { %1278 = vsyncpa [#allocation7 + $0x1], 1 }

</bundles_post_ra>
